<compile_context>
chip_gen: v5e
topology: v5e:2x2
jax: 0.10.0
libtpu: 0.0.40
codegen_flags: <defaults>
</compile_context>

<pallas_src>
import jax
import jax.numpy as jnp
import numpy as np
from jax import lax
from jax.experimental import pallas as pl
from jax.experimental.pallas import tpu as pltpu

FACTOR_TO_NORMALIZE_SOFTPLUS = 0.1
# Explicit per-dot precision (used for the batched input projection, the linear
# head inputs, the covariance matmul and the pure-JAX references).
_PREC_HI = lax.Precision.HIGHEST


# ---------------------------------------------------------------------------
# Fused forward kernel: stacked LSTM + linear head, one pallas_call.
# ---------------------------------------------------------------------------
def _make_fused_forward_kernel(num_layers, seq_len, batch, hidden_dim):
    T, B, H = seq_len, batch, hidden_dim

    def kernel(*refs):
        # refs = (x2d, [wih_l, whh_l, b_l] * L, w_mu, y_out, hs_scratch, gx_scratch)
        x_ref = refs[0]
        w_refs = refs[1:1 + 3 * num_layers]
        wmu_ref = refs[1 + 3 * num_layers]
        y_ref = refs[2 + 3 * num_layers]
        hs_ref = refs[3 + 3 * num_layers]     # (T*B, H)   inter-layer activations
        gx_ref = refs[4 + 3 * num_layers]     # (T*B, 4H)  hoisted input projection

        def run_layer(in_ref, wih_ref, whh_ref, b_ref, write_hs):
            # Phase 1: batched input projection for the whole sequence
            # (one (T*B, in) @ (in, 4H) MXU pass, bias folded in, f32 HIGHEST —
            # it is off the per-step dependency chain).
            gx_ref[...] = (
                jnp.dot(in_ref[...], wih_ref[...],
                        preferred_element_type=jnp.float32, precision=_PREC_HI)
                + b_ref[...])

            # Phase 2: serial recurrence — only h @ Whh + elementwise gate math.
            def step(t, carry):
                h, c = carry
                off = pl.multiple_of(t * B, B)
                # Single bf16 MXU pass with f32 accumulation (W_hh pre-cast at
                # prep time).  The dot sits on the step-to-step dependency chain,
                # so every extra MXU pass is pure wall clock.
                gates = gx_ref[pl.ds(off, B), :] + jnp.dot(
                    h.astype(jnp.bfloat16), whh_ref[...],
                    preferred_element_type=jnp.float32)
                # Gate columns were reordered to (i, f, o, g) at prep time: the
                # EUP evaluates sigmoid only on the 3H lanes that need it and tanh
                # only on the g slice, instead of both over the full 4H block.
                sg = jax.nn.sigmoid(gates[:, :3 * H])
                g = jnp.tanh(gates[:, 3 * H:])
                # NOTE: these are 32-lane extracts from a 128-lane block; at
                # H=32/B=8 the relayout cost is small.  For large H, keep c/h as
                # lane-padded state or split Whh per-gate to avoid the extracts.
                i = sg[:, 0 * H:1 * H]
                f = sg[:, 1 * H:2 * H]
                o = sg[:, 2 * H:3 * H]
                c_new = f * c + i * g
                h_new = o * jnp.tanh(c_new)
                if write_hs:
                    hs_ref[pl.ds(off, B), :] = h_new
                return h_new, c_new

            zeros = jnp.zeros((B, H), jnp.float32)
            # Full unroll only while T is small; bounded unroll avoids vreg spills
            # and i-mem blowup at production sequence lengths.
            unroll = T if T <= 8 else 4
            return lax.fori_loop(0, T, step, (zeros, zeros), unroll=unroll)

        h_last = None
        for layer in range(num_layers):
            wih_ref, whh_ref, b_ref = w_refs[3 * layer:3 * layer + 3]
            in_ref = x_ref if layer == 0 else hs_ref
            write_hs = layer < num_layers - 1   # last layer: keep h only in vregs
            h_last, _ = run_layer(in_ref, wih_ref, whh_ref, b_ref, write_hs)

        # make_linear_product on the VPU: y = h_last @ w_mu[:-1] + w_mu[-1].
        w_row = wmu_ref[:, :H]                  # (1, H)
        bias = wmu_ref[:, H:H + 1]              # (1, 1)
        y_ref[...] = jnp.sum(h_last * w_row, axis=-1, keepdims=True) + bias

    return kernel


def _reorder_gate_rows(w):
    """PyTorch LSTM gate block order (i, f, g, o) -> kernel order (i, f, o, g)."""
    H = w.shape[0] // 4
    return jnp.concatenate([w[:2 * H], w[3 * H:4 * H], w[2 * H:3 * H]], axis=0)


def prepare_params(lstm_weights, weights_mu):
    """One-time weight prep, hoisted out of the jitted forward (review item).

    Returns (layer_params, w_mu_row) where layer_params[l] = (wih_t, whh_t, b):
      wih_t : (in, 4H) f32, gate columns reordered to (i, f, o, g)
      whh_t : (H, 4H)  bf16 (single-pass MXU operand for the recurrent dot)
      b     : (1, 4H)  f32, b_ih + b_hh fused, reordered
    """
    layers = []
    for (w_ih, w_hh, b_ih, b_hh) in lstm_weights:
        wih_t = jnp.transpose(_reorder_gate_rows(w_ih)).astype(jnp.float32)
        whh_t = jnp.transpose(_reorder_gate_rows(w_hh)).astype(jnp.bfloat16)
        b = _reorder_gate_rows(b_ih + b_hh)[None, :].astype(jnp.float32)
        layers.append((wih_t, whh_t, b))
    w_mu_row = weights_mu[None, :].astype(jnp.float32)          # (1, H+1)
    return tuple(layers), w_mu_row


@jax.jit
def forward(x, layer_params, w_mu_row):
    """Training + pretraining + activate_noise=False path. Returns y_pred (B,)."""
    T, B, I = x.shape
    num_layers = len(layer_params)
    H = layer_params[0][1].shape[0]

    x2d = x.reshape(T * B, I)
    flat_inputs = [x2d]
    for (wih_t, whh_t, b) in layer_params:
        flat_inputs += [wih_t, whh_t, b]
    flat_inputs.append(w_mu_row)

    # Advisory cost estimate so XLA schedules the tiny custom call sensibly.
    flops = 2 * B * H
    transcendentals = 0
    in_dim = I
    for _ in range(num_layers):
        flops += 2 * T * B * in_dim * 4 * H          # hoisted input projection
        flops += 2 * T * B * H * 4 * H               # recurrent dots
        flops += 10 * T * B * H                      # elementwise gate math
        transcendentals += T * B * 5 * H             # sigmoid(3H) + tanh(H) + tanh(c)
        in_dim = H
    bytes_accessed = int(sum(int(np.prod(a.shape)) * a.dtype.itemsize
                             for a in flat_inputs)) + B * 4

    # Explicit VMEM budget (guards the fused design on v7x's 64 MiB VMEM; at large
    # H*T*B the Phase-1 gx scratch should be time-chunked instead).
    scratch_bytes = T * B * H * 4 + T * B * 4 * H * 4
    vmem_limit = int(max(4 * (scratch_bytes + bytes_accessed), 8 * 1024 * 1024))

    kernel = _make_fused_forward_kernel(num_layers, T, B, H)
    vmem_spec = pl.BlockSpec(memory_space=pltpu.MemorySpace.VMEM)
    y = pl.pallas_call(
        kernel,
        out_shape=jax.ShapeDtypeStruct((B, 1), jnp.float32),
        in_specs=[vmem_spec] * len(flat_inputs),
        out_specs=vmem_spec,
        scratch_shapes=[pltpu.VMEM((T * B, H), jnp.float32),
                        pltpu.VMEM((T * B, 4 * H), jnp.float32)],
        compiler_params=pltpu.CompilerParams(vmem_limit_bytes=vmem_limit),
        cost_estimate=pl.CostEstimate(flops=flops,
                                      transcendentals=transcendentals,
                                      bytes_accessed=bytes_accessed),
    )(*flat_inputs)
    return y[:, 0]                                   # .view(-1)


# ---------------------------------------------------------------------------
# covariance_matrix property: 0.1 * softplus(F^T F)
# ---------------------------------------------------------------------------
def _covariance_kernel(ft_ref, f_ref, cov_ref):
    m = jnp.dot(ft_ref[...], f_ref[...],
                preferred_element_type=jnp.float32, precision=_PREC_HI)
    cov_ref[...] = FACTOR_TO_NORMALIZE_SOFTPLUS * jax.nn.softplus(m)


@jax.jit
def covariance_matrix(cov_factor):
    # TODO(synk): the single-operand form (lax.dot_general(f, f, (((0,),(0,)),((),()))))
    # would drop the second input DMA, but the (H+1, H+1)=(33, 33) operand is not
    # tile-aligned and a transposed-LHS lowering may materialize an unaligned
    # in-kernel transpose; the extra ~4 KiB DMA is negligible at this size, so the
    # known-good pre-transposed two-operand form is kept.
    Hp1 = cov_factor.shape[0]
    vmem_spec = pl.BlockSpec(memory_space=pltpu.MemorySpace.VMEM)
    return pl.pallas_call(
        _covariance_kernel,
        out_shape=jax.ShapeDtypeStruct((Hp1, Hp1), jnp.float32),
        in_specs=[vmem_spec, vmem_spec],
        out_specs=vmem_spec,
    )(jnp.transpose(cov_factor), cov_factor)


# ---------------------------------------------------------------------------
# Pure-JAX references (PyTorch f32 semantics, for correctness check)
# ---------------------------------------------------------------------------
def forward_ref(x, lstm_weights, weights_mu):
    out = x
    for (w_ih, w_hh, b_ih, b_hh) in lstm_weights:
        T, B, _ = out.shape
        H = w_hh.shape[1]

        def step(carry, x_t):
            h, c = carry
            gates = (jnp.dot(x_t, w_ih.T, precision=_PREC_HI)
                     + jnp.dot(h, w_hh.T, precision=_PREC_HI) + b_ih + b_hh)
            i, f, g, o = jnp.split(gates, 4, axis=-1)
            i, f, o = jax.nn.sigmoid(i), jax.nn.sigmoid(f), jax.nn.sigmoid(o)
            g = jnp.tanh(g)
            c = f * c + i * g
            h = o * jnp.tanh(c)
            return (h, c), h

        (_, _), hs = jax.lax.scan(
            step,
            (jnp.zeros((B, H), jnp.float32), jnp.zeros((B, H), jnp.float32)),
            out)
        out = hs
    h_last = out[-1]
    return jnp.dot(h_last, weights_mu[:-1], precision=_PREC_HI) + weights_mu[-1]


def covariance_matrix_ref(cov_factor):
    m = jnp.dot(cov_factor.T, cov_factor, precision=_PREC_HI)
    return FACTOR_TO_NORMALIZE_SOFTPLUS * jax.nn.softplus(m)


# ---------------------------------------------------------------------------
if __name__ == "__main__":
    SEQ_LEN, BATCH, INPUT_DIM, HIDDEN_DIM, NUM_LAYERS = 8, 8, 8, 32, 2
    Hp1 = HIDDEN_DIM + 1

    key = jax.random.PRNGKey(0)
    kx, kmu, kf, kw = jax.random.split(key, 4)

    # Input sequence (time-major, like nn.LSTM with batch_first=False).
    x = jax.random.normal(kx, (SEQ_LEN, BATCH, INPUT_DIM), dtype=jnp.float32)

    # Deterministic synthetic LSTM parameters (PyTorch-style uniform(-k, k)).
    kinit = 1.0 / float(np.sqrt(HIDDEN_DIM))
    lstm_weights = []
    wkeys = jax.random.split(kw, NUM_LAYERS * 4)
    for layer in range(NUM_LAYERS):
        in_dim = INPUT_DIM if layer == 0 else HIDDEN_DIM
        k0, k1, k2, k3 = wkeys[4 * layer:4 * layer + 4]
        w_ih = jax.random.uniform(k0, (4 * HIDDEN_DIM, in_dim),
                                  minval=-kinit, maxval=kinit, dtype=jnp.float32)
        w_hh = jax.random.uniform(k1, (4 * HIDDEN_DIM, HIDDEN_DIM),
                                  minval=-kinit, maxval=kinit, dtype=jnp.float32)
        b_ih = jax.random.uniform(k2, (4 * HIDDEN_DIM,),
                                  minval=-kinit, maxval=kinit, dtype=jnp.float32)
        b_hh = jax.random.uniform(k3, (4 * HIDDEN_DIM,),
                                  minval=-kinit, maxval=kinit, dtype=jnp.float32)
        lstm_weights.append((w_ih, w_hh, b_ih, b_hh))

    # NOTE: the PyTorch module initializes weights_mu to zeros (-> all-zero output);
    # we use small deterministic nonzero values so the correctness check is non-trivial.
    weights_mu = 0.05 * jax.random.normal(kmu, (Hp1,), dtype=jnp.float32)

    # covariance_factor: lower-triangular with Uniform(0.3, 0.7) entries.
    cov_factor = jnp.tril(jax.random.uniform(
        kf, (Hp1, Hp1), minval=0.3, maxval=0.7, dtype=jnp.float32))

    # One-time weight prep (transpose / reorder / bias fusion / bf16 W_hh).
    layer_params, w_mu_row = prepare_params(lstm_weights, weights_mu)

    # Run kernels.
    y_pred = jax.block_until_ready(forward(x, layer_params, w_mu_row))
    cov = jax.block_until_ready(covariance_matrix(cov_factor))

    # Verify against pure-JAX references.  The y tolerance is 1e-3 because the
    # recurrent h @ Whh dot intentionally runs with bf16 operands (f32 accumulation)
    # per the perf review; measured deviation is O(1e-4) at these shapes.
    y_ref = jax.block_until_ready(forward_ref(x, lstm_weights, weights_mu))
    cov_ref = jax.block_until_ready(covariance_matrix_ref(cov_factor))
    np.testing.assert_allclose(np.asarray(y_pred), np.asarray(y_ref),
                               rtol=1e-3, atol=1e-3)
    np.testing.assert_allclose(np.asarray(cov), np.asarray(cov_ref),
                               rtol=1e-4, atol=1e-4)
    assert y_pred.shape == (BATCH,)
    assert cov.shape == (Hp1, Hp1)

    print("KERNEL_OK")
</pallas_src>

<mosaic_0001>
module attributes {stable_mosaic.version = 11 : i64} {
  func.func @kernel(%arg0: memref<64x8xf32, #tpu.memory_space<vmem>>, %arg1: memref<8x128xf32, #tpu.memory_space<vmem>>, %arg2: memref<32x128xbf16, #tpu.memory_space<vmem>>, %arg3: memref<1x128xf32, #tpu.memory_space<vmem>>, %arg4: memref<32x128xf32, #tpu.memory_space<vmem>>, %arg5: memref<32x128xbf16, #tpu.memory_space<vmem>>, %arg6: memref<1x128xf32, #tpu.memory_space<vmem>>, %arg7: memref<1x33xf32, #tpu.memory_space<vmem>>, %arg8: memref<8x1xf32, #tpu.memory_space<vmem>>, %arg9: memref<64x32xf32, #tpu.memory_space<vmem>>, %arg10: memref<64x128xf32, #tpu.memory_space<vmem>>) attributes {dimension_semantics = [], scalar_prefetch = 0 : i64, scratch_operands = 2 : i64, tpu.core_type = #tpu.core_type<tc>} {
    %c0 = arith.constant 0 : index
    %c0_0 = arith.constant 0 : index
    %0 = vector.load %arg0[%c0, %c0_0] : memref<64x8xf32, #tpu.memory_space<vmem>>, vector<64x8xf32>
    %c0_1 = arith.constant 0 : index
    %c0_2 = arith.constant 0 : index
    %1 = vector.load %arg1[%c0_1, %c0_2] : memref<8x128xf32, #tpu.memory_space<vmem>>, vector<8x128xf32>
    %cst = arith.constant dense<0.000000e+00> : vector<64x128xf32>
    %2 = tpu.matmul %0, %1, %cst {dimension_numbers = #tpu.dot_dimension_numbers<[1], [0], [0], [1], [0, 0, 1, 1], [], []>, precision = #tpu.contract_precision<fp32>} : vector<64x8xf32>, vector<8x128xf32>, vector<64x128xf32> -> vector<64x128xf32>
    %c0_3 = arith.constant 0 : index
    %c0_4 = arith.constant 0 : index
    %3 = vector.load %arg3[%c0_3, %c0_4] : memref<1x128xf32, #tpu.memory_space<vmem>>, vector<1x128xf32>
    %4 = vector.broadcast %3 : vector<1x128xf32> to vector<64x128xf32>
    %5 = arith.addf %2, %4 : vector<64x128xf32>
    %c0_5 = arith.constant 0 : index
    %c0_6 = arith.constant 0 : index
    %6 = vector.load %arg10[%c0_5, %c0_6] : memref<64x128xf32, #tpu.memory_space<vmem>>, vector<64x128xf32>
    tpu.vector_store %arg10[%c0_5, %c0_6], %5 {strides = array<i32>} : memref<64x128xf32, #tpu.memory_space<vmem>>, vector<64x128xf32>,
    %cst_7 = arith.constant 0.000000e+00 : f32
    %7 = vector.broadcast %cst_7 : f32 to vector<8x32xf32>
    %c0_i32 = arith.constant 0 : i32
    %c8_i32 = arith.constant 8 : i32
    %8 = arith.muli %c0_i32, %c8_i32 : i32
    %9 = tpu.assume_multiple %8, 8 : i32
    %10 = arith.index_cast %9 : i32 to index
    %c0_8 = arith.constant 0 : index
    %11 = vector.load %arg10[%10, %c0_8] : memref<64x128xf32, #tpu.memory_space<vmem>>, vector<8x128xf32>
    %12 = arith.truncf %7 : vector<8x32xf32> to vector<8x32xbf16>
    %c0_9 = arith.constant 0 : index
    %c0_10 = arith.constant 0 : index
    %13 = vector.load %arg2[%c0_9, %c0_10] : memref<32x128xbf16, #tpu.memory_space<vmem>>, vector<32x128xbf16>
    %cst_11 = arith.constant dense<0.000000e+00> : vector<8x128xf32>
    %14 = tpu.matmul %12, %13, %cst_11 {dimension_numbers = #tpu.dot_dimension_numbers<[1], [0], [0], [1], [0, 0, 1, 1], [], []>} : vector<8x32xbf16>, vector<32x128xbf16>, vector<8x128xf32> -> vector<8x128xf32>
    %15 = arith.addf %11, %14 : vector<8x128xf32>
    %16 = vector.extract_strided_slice %15 {offsets = [0, 0], sizes = [8, 96], strides = [1, 1]} : vector<8x128xf32> to vector<8x96xf32>
    %17 = arith.negf %16 : vector<8x96xf32>
    %18 = math.exp %17 : vector<8x96xf32>
    %cst_12 = arith.constant 1.000000e+00 : f32
    %19 = vector.broadcast %cst_12 : f32 to vector<8x96xf32>
    %20 = arith.addf %19, %18 : vector<8x96xf32>
    %21 = arith.divf %19, %20 : vector<8x96xf32>
    %22 = vector.extract_strided_slice %15 {offsets = [0, 96], sizes = [8, 32], strides = [1, 1]} : vector<8x128xf32> to vector<8x32xf32>
    %23 = math.tanh %22 : vector<8x32xf32>
    %24 = vector.extract_strided_slice %21 {offsets = [0, 0], sizes = [8, 32], strides = [1, 1]} : vector<8x96xf32> to vector<8x32xf32>
    %25 = vector.extract_strided_slice %21 {offsets = [0, 32], sizes = [8, 32], strides = [1, 1]} : vector<8x96xf32> to vector<8x32xf32>
    %26 = vector.extract_strided_slice %21 {offsets = [0, 64], sizes = [8, 32], strides = [1, 1]} : vector<8x96xf32> to vector<8x32xf32>
    %27 = arith.mulf %25, %7 : vector<8x32xf32>
    %28 = arith.mulf %24, %23 : vector<8x32xf32>
    %29 = arith.addf %27, %28 : vector<8x32xf32>
    %30 = math.tanh %29 : vector<8x32xf32>
    %31 = arith.mulf %26, %30 : vector<8x32xf32>
    %32 = arith.index_cast %9 : i32 to index
    %c0_13 = arith.constant 0 : index
    %33 = vector.load %arg9[%32, %c0_13] : memref<64x32xf32, #tpu.memory_space<vmem>>, vector<8x32xf32>
    tpu.vector_store %arg9[%32, %c0_13], %31 {strides = array<i32>} : memref<64x32xf32, #tpu.memory_space<vmem>>, vector<8x32xf32>,
    %c1_i32 = arith.constant 1 : i32
    %c8_i32_14 = arith.constant 8 : i32
    %34 = arith.muli %c1_i32, %c8_i32_14 : i32
    %35 = tpu.assume_multiple %34, 8 : i32
    %36 = arith.index_cast %35 : i32 to index
    %c0_15 = arith.constant 0 : index
    %37 = vector.load %arg10[%36, %c0_15] : memref<64x128xf32, #tpu.memory_space<vmem>>, vector<8x128xf32>
    %38 = arith.truncf %31 : vector<8x32xf32> to vector<8x32xbf16>
    %c0_16 = arith.constant 0 : index
    %c0_17 = arith.constant 0 : index
    %39 = vector.load %arg2[%c0_16, %c0_17] : memref<32x128xbf16, #tpu.memory_space<vmem>>, vector<32x128xbf16>
    %cst_18 = arith.constant dense<0.000000e+00> : vector<8x128xf32>
    %40 = tpu.matmul %38, %39, %cst_18 {dimension_numbers = #tpu.dot_dimension_numbers<[1], [0], [0], [1], [0, 0, 1, 1], [], []>} : vector<8x32xbf16>, vector<32x128xbf16>, vector<8x128xf32> -> vector<8x128xf32>
    %41 = arith.addf %37, %40 : vector<8x128xf32>
    %42 = vector.extract_strided_slice %41 {offsets = [0, 0], sizes = [8, 96], strides = [1, 1]} : vector<8x128xf32> to vector<8x96xf32>
    %43 = arith.negf %42 : vector<8x96xf32>
    %44 = math.exp %43 : vector<8x96xf32>
    %cst_19 = arith.constant 1.000000e+00 : f32
    %45 = vector.broadcast %cst_19 : f32 to vector<8x96xf32>
    %46 = arith.addf %45, %44 : vector<8x96xf32>
    %47 = arith.divf %45, %46 : vector<8x96xf32>
    %48 = vector.extract_strided_slice %41 {offsets = [0, 96], sizes = [8, 32], strides = [1, 1]} : vector<8x128xf32> to vector<8x32xf32>
    %49 = math.tanh %48 : vector<8x32xf32>
    %50 = vector.extract_strided_slice %47 {offsets = [0, 0], sizes = [8, 32], strides = [1, 1]} : vector<8x96xf32> to vector<8x32xf32>
    %51 = vector.extract_strided_slice %47 {offsets = [0, 32], sizes = [8, 32], strides = [1, 1]} : vector<8x96xf32> to vector<8x32xf32>
    %52 = vector.extract_strided_slice %47 {offsets = [0, 64], sizes = [8, 32], strides = [1, 1]} : vector<8x96xf32> to vector<8x32xf32>
    %53 = arith.mulf %51, %29 : vector<8x32xf32>
    %54 = arith.mulf %50, %49 : vector<8x32xf32>
    %55 = arith.addf %53, %54 : vector<8x32xf32>
    %56 = math.tanh %55 : vector<8x32xf32>
    %57 = arith.mulf %52, %56 : vector<8x32xf32>
    %58 = arith.index_cast %35 : i32 to index
    %c0_20 = arith.constant 0 : index
    %59 = vector.load %arg9[%58, %c0_20] : memref<64x32xf32, #tpu.memory_space<vmem>>, vector<8x32xf32>
    tpu.vector_store %arg9[%58, %c0_20], %57 {strides = array<i32>} : memref<64x32xf32, #tpu.memory_space<vmem>>, vector<8x32xf32>,
    %c2_i32 = arith.constant 2 : i32
    %c8_i32_21 = arith.constant 8 : i32
    %60 = arith.muli %c2_i32, %c8_i32_21 : i32
    %61 = tpu.assume_multiple %60, 8 : i32
    %62 = arith.index_cast %61 : i32 to index
    %c0_22 = arith.constant 0 : index
    %63 = vector.load %arg10[%62, %c0_22] : memref<64x128xf32, #tpu.memory_space<vmem>>, vector<8x128xf32>
    %64 = arith.truncf %57 : vector<8x32xf32> to vector<8x32xbf16>
    %c0_23 = arith.constant 0 : index
    %c0_24 = arith.constant 0 : index
    %65 = vector.load %arg2[%c0_23, %c0_24] : memref<32x128xbf16, #tpu.memory_space<vmem>>, vector<32x128xbf16>
    %cst_25 = arith.constant dense<0.000000e+00> : vector<8x128xf32>
    %66 = tpu.matmul %64, %65, %cst_25 {dimension_numbers = #tpu.dot_dimension_numbers<[1], [0], [0], [1], [0, 0, 1, 1], [], []>} : vector<8x32xbf16>, vector<32x128xbf16>, vector<8x128xf32> -> vector<8x128xf32>
    %67 = arith.addf %63, %66 : vector<8x128xf32>
    %68 = vector.extract_strided_slice %67 {offsets = [0, 0], sizes = [8, 96], strides = [1, 1]} : vector<8x128xf32> to vector<8x96xf32>
    %69 = arith.negf %68 : vector<8x96xf32>
    %70 = math.exp %69 : vector<8x96xf32>
    %cst_26 = arith.constant 1.000000e+00 : f32
    %71 = vector.broadcast %cst_26 : f32 to vector<8x96xf32>
    %72 = arith.addf %71, %70 : vector<8x96xf32>
    %73 = arith.divf %71, %72 : vector<8x96xf32>
    %74 = vector.extract_strided_slice %67 {offsets = [0, 96], sizes = [8, 32], strides = [1, 1]} : vector<8x128xf32> to vector<8x32xf32>
    %75 = math.tanh %74 : vector<8x32xf32>
    %76 = vector.extract_strided_slice %73 {offsets = [0, 0], sizes = [8, 32], strides = [1, 1]} : vector<8x96xf32> to vector<8x32xf32>
    %77 = vector.extract_strided_slice %73 {offsets = [0, 32], sizes = [8, 32], strides = [1, 1]} : vector<8x96xf32> to vector<8x32xf32>
    %78 = vector.extract_strided_slice %73 {offsets = [0, 64], sizes = [8, 32], strides = [1, 1]} : vector<8x96xf32> to vector<8x32xf32>
    %79 = arith.mulf %77, %55 : vector<8x32xf32>
    %80 = arith.mulf %76, %75 : vector<8x32xf32>
    %81 = arith.addf %79, %80 : vector<8x32xf32>
    %82 = math.tanh %81 : vector<8x32xf32>
    %83 = arith.mulf %78, %82 : vector<8x32xf32>
    %84 = arith.index_cast %61 : i32 to index
    %c0_27 = arith.constant 0 : index
    %85 = vector.load %arg9[%84, %c0_27] : memref<64x32xf32, #tpu.memory_space<vmem>>, vector<8x32xf32>
    tpu.vector_store %arg9[%84, %c0_27], %83 {strides = array<i32>} : memref<64x32xf32, #tpu.memory_space<vmem>>, vector<8x32xf32>,
    %c3_i32 = arith.constant 3 : i32
    %c8_i32_28 = arith.constant 8 : i32
    %86 = arith.muli %c3_i32, %c8_i32_28 : i32
    %87 = tpu.assume_multiple %86, 8 : i32
    %88 = arith.index_cast %87 : i32 to index
    %c0_29 = arith.constant 0 : index
    %89 = vector.load %arg10[%88, %c0_29] : memref<64x128xf32, #tpu.memory_space<vmem>>, vector<8x128xf32>
    %90 = arith.truncf %83 : vector<8x32xf32> to vector<8x32xbf16>
    %c0_30 = arith.constant 0 : index
    %c0_31 = arith.constant 0 : index
    %91 = vector.load %arg2[%c0_30, %c0_31] : memref<32x128xbf16, #tpu.memory_space<vmem>>, vector<32x128xbf16>
    %cst_32 = arith.constant dense<0.000000e+00> : vector<8x128xf32>
    %92 = tpu.matmul %90, %91, %cst_32 {dimension_numbers = #tpu.dot_dimension_numbers<[1], [0], [0], [1], [0, 0, 1, 1], [], []>} : vector<8x32xbf16>, vector<32x128xbf16>, vector<8x128xf32> -> vector<8x128xf32>
    %93 = arith.addf %89, %92 : vector<8x128xf32>
    %94 = vector.extract_strided_slice %93 {offsets = [0, 0], sizes = [8, 96], strides = [1, 1]} : vector<8x128xf32> to vector<8x96xf32>
    %95 = arith.negf %94 : vector<8x96xf32>
    %96 = math.exp %95 : vector<8x96xf32>
    %cst_33 = arith.constant 1.000000e+00 : f32
    %97 = vector.broadcast %cst_33 : f32 to vector<8x96xf32>
    %98 = arith.addf %97, %96 : vector<8x96xf32>
    %99 = arith.divf %97, %98 : vector<8x96xf32>
    %100 = vector.extract_strided_slice %93 {offsets = [0, 96], sizes = [8, 32], strides = [1, 1]} : vector<8x128xf32> to vector<8x32xf32>
    %101 = math.tanh %100 : vector<8x32xf32>
    %102 = vector.extract_strided_slice %99 {offsets = [0, 0], sizes = [8, 32], strides = [1, 1]} : vector<8x96xf32> to vector<8x32xf32>
    %103 = vector.extract_strided_slice %99 {offsets = [0, 32], sizes = [8, 32], strides = [1, 1]} : vector<8x96xf32> to vector<8x32xf32>
    %104 = vector.extract_strided_slice %99 {offsets = [0, 64], sizes = [8, 32], strides = [1, 1]} : vector<8x96xf32> to vector<8x32xf32>
    %105 = arith.mulf %103, %81 : vector<8x32xf32>
    %106 = arith.mulf %102, %101 : vector<8x32xf32>
    %107 = arith.addf %105, %106 : vector<8x32xf32>
    %108 = math.tanh %107 : vector<8x32xf32>
    %109 = arith.mulf %104, %108 : vector<8x32xf32>
    %110 = arith.index_cast %87 : i32 to index
    %c0_34 = arith.constant 0 : index
    %111 = vector.load %arg9[%110, %c0_34] : memref<64x32xf32, #tpu.memory_space<vmem>>, vector<8x32xf32>
    tpu.vector_store %arg9[%110, %c0_34], %109 {strides = array<i32>} : memref<64x32xf32, #tpu.memory_space<vmem>>, vector<8x32xf32>,
    %c4_i32 = arith.constant 4 : i32
    %c8_i32_35 = arith.constant 8 : i32
    %112 = arith.muli %c4_i32, %c8_i32_35 : i32
    %113 = tpu.assume_multiple %112, 8 : i32
    %114 = arith.index_cast %113 : i32 to index
    %c0_36 = arith.constant 0 : index
    %115 = vector.load %arg10[%114, %c0_36] : memref<64x128xf32, #tpu.memory_space<vmem>>, vector<8x128xf32>
    %116 = arith.truncf %109 : vector<8x32xf32> to vector<8x32xbf16>
    %c0_37 = arith.constant 0 : index
    %c0_38 = arith.constant 0 : index
    %117 = vector.load %arg2[%c0_37, %c0_38] : memref<32x128xbf16, #tpu.memory_space<vmem>>, vector<32x128xbf16>
    %cst_39 = arith.constant dense<0.000000e+00> : vector<8x128xf32>
    %118 = tpu.matmul %116, %117, %cst_39 {dimension_numbers = #tpu.dot_dimension_numbers<[1], [0], [0], [1], [0, 0, 1, 1], [], []>} : vector<8x32xbf16>, vector<32x128xbf16>, vector<8x128xf32> -> vector<8x128xf32>
    %119 = arith.addf %115, %118 : vector<8x128xf32>
    %120 = vector.extract_strided_slice %119 {offsets = [0, 0], sizes = [8, 96], strides = [1, 1]} : vector<8x128xf32> to vector<8x96xf32>
    %121 = arith.negf %120 : vector<8x96xf32>
    %122 = math.exp %121 : vector<8x96xf32>
    %cst_40 = arith.constant 1.000000e+00 : f32
    %123 = vector.broadcast %cst_40 : f32 to vector<8x96xf32>
    %124 = arith.addf %123, %122 : vector<8x96xf32>
    %125 = arith.divf %123, %124 : vector<8x96xf32>
    %126 = vector.extract_strided_slice %119 {offsets = [0, 96], sizes = [8, 32], strides = [1, 1]} : vector<8x128xf32> to vector<8x32xf32>
    %127 = math.tanh %126 : vector<8x32xf32>
    %128 = vector.extract_strided_slice %125 {offsets = [0, 0], sizes = [8, 32], strides = [1, 1]} : vector<8x96xf32> to vector<8x32xf32>
    %129 = vector.extract_strided_slice %125 {offsets = [0, 32], sizes = [8, 32], strides = [1, 1]} : vector<8x96xf32> to vector<8x32xf32>
    %130 = vector.extract_strided_slice %125 {offsets = [0, 64], sizes = [8, 32], strides = [1, 1]} : vector<8x96xf32> to vector<8x32xf32>
    %131 = arith.mulf %129, %107 : vector<8x32xf32>
    %132 = arith.mulf %128, %127 : vector<8x32xf32>
    %133 = arith.addf %131, %132 : vector<8x32xf32>
    %134 = math.tanh %133 : vector<8x32xf32>
    %135 = arith.mulf %130, %134 : vector<8x32xf32>
    %136 = arith.index_cast %113 : i32 to index
    %c0_41 = arith.constant 0 : index
    %137 = vector.load %arg9[%136, %c0_41] : memref<64x32xf32, #tpu.memory_space<vmem>>, vector<8x32xf32>
    tpu.vector_store %arg9[%136, %c0_41], %135 {strides = array<i32>} : memref<64x32xf32, #tpu.memory_space<vmem>>, vector<8x32xf32>,
    %c5_i32 = arith.constant 5 : i32
    %c8_i32_42 = arith.constant 8 : i32
    %138 = arith.muli %c5_i32, %c8_i32_42 : i32
    %139 = tpu.assume_multiple %138, 8 : i32
    %140 = arith.index_cast %139 : i32 to index
    %c0_43 = arith.constant 0 : index
    %141 = vector.load %arg10[%140, %c0_43] : memref<64x128xf32, #tpu.memory_space<vmem>>, vector<8x128xf32>
    %142 = arith.truncf %135 : vector<8x32xf32> to vector<8x32xbf16>
    %c0_44 = arith.constant 0 : index
    %c0_45 = arith.constant 0 : index
    %143 = vector.load %arg2[%c0_44, %c0_45] : memref<32x128xbf16, #tpu.memory_space<vmem>>, vector<32x128xbf16>
    %cst_46 = arith.constant dense<0.000000e+00> : vector<8x128xf32>
    %144 = tpu.matmul %142, %143, %cst_46 {dimension_numbers = #tpu.dot_dimension_numbers<[1], [0], [0], [1], [0, 0, 1, 1], [], []>} : vector<8x32xbf16>, vector<32x128xbf16>, vector<8x128xf32> -> vector<8x128xf32>
    %145 = arith.addf %141, %144 : vector<8x128xf32>
    %146 = vector.extract_strided_slice %145 {offsets = [0, 0], sizes = [8, 96], strides = [1, 1]} : vector<8x128xf32> to vector<8x96xf32>
    %147 = arith.negf %146 : vector<8x96xf32>
    %148 = math.exp %147 : vector<8x96xf32>
    %cst_47 = arith.constant 1.000000e+00 : f32
    %149 = vector.broadcast %cst_47 : f32 to vector<8x96xf32>
    %150 = arith.addf %149, %148 : vector<8x96xf32>
    %151 = arith.divf %149, %150 : vector<8x96xf32>
    %152 = vector.extract_strided_slice %145 {offsets = [0, 96], sizes = [8, 32], strides = [1, 1]} : vector<8x128xf32> to vector<8x32xf32>
    %153 = math.tanh %152 : vector<8x32xf32>
    %154 = vector.extract_strided_slice %151 {offsets = [0, 0], sizes = [8, 32], strides = [1, 1]} : vector<8x96xf32> to vector<8x32xf32>
    %155 = vector.extract_strided_slice %151 {offsets = [0, 32], sizes = [8, 32], strides = [1, 1]} : vector<8x96xf32> to vector<8x32xf32>
    %156 = vector.extract_strided_slice %151 {offsets = [0, 64], sizes = [8, 32], strides = [1, 1]} : vector<8x96xf32> to vector<8x32xf32>
    %157 = arith.mulf %155, %133 : vector<8x32xf32>
    %158 = arith.mulf %154, %153 : vector<8x32xf32>
    %159 = arith.addf %157, %158 : vector<8x32xf32>
    %160 = math.tanh %159 : vector<8x32xf32>
    %161 = arith.mulf %156, %160 : vector<8x32xf32>
    %162 = arith.index_cast %139 : i32 to index
    %c0_48 = arith.constant 0 : index
    %163 = vector.load %arg9[%162, %c0_48] : memref<64x32xf32, #tpu.memory_space<vmem>>, vector<8x32xf32>
    tpu.vector_store %arg9[%162, %c0_48], %161 {strides = array<i32>} : memref<64x32xf32, #tpu.memory_space<vmem>>, vector<8x32xf32>,
    %c6_i32 = arith.constant 6 : i32
    %c8_i32_49 = arith.constant 8 : i32
    %164 = arith.muli %c6_i32, %c8_i32_49 : i32
    %165 = tpu.assume_multiple %164, 8 : i32
    %166 = arith.index_cast %165 : i32 to index
    %c0_50 = arith.constant 0 : index
    %167 = vector.load %arg10[%166, %c0_50] : memref<64x128xf32, #tpu.memory_space<vmem>>, vector<8x128xf32>
    %168 = arith.truncf %161 : vector<8x32xf32> to vector<8x32xbf16>
    %c0_51 = arith.constant 0 : index
    %c0_52 = arith.constant 0 : index
    %169 = vector.load %arg2[%c0_51, %c0_52] : memref<32x128xbf16, #tpu.memory_space<vmem>>, vector<32x128xbf16>
    %cst_53 = arith.constant dense<0.000000e+00> : vector<8x128xf32>
    %170 = tpu.matmul %168, %169, %cst_53 {dimension_numbers = #tpu.dot_dimension_numbers<[1], [0], [0], [1], [0, 0, 1, 1], [], []>} : vector<8x32xbf16>, vector<32x128xbf16>, vector<8x128xf32> -> vector<8x128xf32>
    %171 = arith.addf %167, %170 : vector<8x128xf32>
    %172 = vector.extract_strided_slice %171 {offsets = [0, 0], sizes = [8, 96], strides = [1, 1]} : vector<8x128xf32> to vector<8x96xf32>
    %173 = arith.negf %172 : vector<8x96xf32>
    %174 = math.exp %173 : vector<8x96xf32>
    %cst_54 = arith.constant 1.000000e+00 : f32
    %175 = vector.broadcast %cst_54 : f32 to vector<8x96xf32>
    %176 = arith.addf %175, %174 : vector<8x96xf32>
    %177 = arith.divf %175, %176 : vector<8x96xf32>
    %178 = vector.extract_strided_slice %171 {offsets = [0, 96], sizes = [8, 32], strides = [1, 1]} : vector<8x128xf32> to vector<8x32xf32>
    %179 = math.tanh %178 : vector<8x32xf32>
    %180 = vector.extract_strided_slice %177 {offsets = [0, 0], sizes = [8, 32], strides = [1, 1]} : vector<8x96xf32> to vector<8x32xf32>
    %181 = vector.extract_strided_slice %177 {offsets = [0, 32], sizes = [8, 32], strides = [1, 1]} : vector<8x96xf32> to vector<8x32xf32>
    %182 = vector.extract_strided_slice %177 {offsets = [0, 64], sizes = [8, 32], strides = [1, 1]} : vector<8x96xf32> to vector<8x32xf32>
    %183 = arith.mulf %181, %159 : vector<8x32xf32>
    %184 = arith.mulf %180, %179 : vector<8x32xf32>
    %185 = arith.addf %183, %184 : vector<8x32xf32>
    %186 = math.tanh %185 : vector<8x32xf32>
    %187 = arith.mulf %182, %186 : vector<8x32xf32>
    %188 = arith.index_cast %165 : i32 to index
    %c0_55 = arith.constant 0 : index
    %189 = vector.load %arg9[%188, %c0_55] : memref<64x32xf32, #tpu.memory_space<vmem>>, vector<8x32xf32>
    tpu.vector_store %arg9[%188, %c0_55], %187 {strides = array<i32>} : memref<64x32xf32, #tpu.memory_space<vmem>>, vector<8x32xf32>,
    %c7_i32 = arith.constant 7 : i32
    %c8_i32_56 = arith.constant 8 : i32
    %190 = arith.muli %c7_i32, %c8_i32_56 : i32
    %191 = tpu.assume_multiple %190, 8 : i32
    %192 = arith.index_cast %191 : i32 to index
    %c0_57 = arith.constant 0 : index
    %193 = vector.load %arg10[%192, %c0_57] : memref<64x128xf32, #tpu.memory_space<vmem>>, vector<8x128xf32>
    %194 = arith.truncf %187 : vector<8x32xf32> to vector<8x32xbf16>
    %c0_58 = arith.constant 0 : index
    %c0_59 = arith.constant 0 : index
    %195 = vector.load %arg2[%c0_58, %c0_59] : memref<32x128xbf16, #tpu.memory_space<vmem>>, vector<32x128xbf16>
    %cst_60 = arith.constant dense<0.000000e+00> : vector<8x128xf32>
    %196 = tpu.matmul %194, %195, %cst_60 {dimension_numbers = #tpu.dot_dimension_numbers<[1], [0], [0], [1], [0, 0, 1, 1], [], []>} : vector<8x32xbf16>, vector<32x128xbf16>, vector<8x128xf32> -> vector<8x128xf32>
    %197 = arith.addf %193, %196 : vector<8x128xf32>
    %198 = vector.extract_strided_slice %197 {offsets = [0, 0], sizes = [8, 96], strides = [1, 1]} : vector<8x128xf32> to vector<8x96xf32>
    %199 = arith.negf %198 : vector<8x96xf32>
    %200 = math.exp %199 : vector<8x96xf32>
    %cst_61 = arith.constant 1.000000e+00 : f32
    %201 = vector.broadcast %cst_61 : f32 to vector<8x96xf32>
    %202 = arith.addf %201, %200 : vector<8x96xf32>
    %203 = arith.divf %201, %202 : vector<8x96xf32>
    %204 = vector.extract_strided_slice %197 {offsets = [0, 96], sizes = [8, 32], strides = [1, 1]} : vector<8x128xf32> to vector<8x32xf32>
    %205 = math.tanh %204 : vector<8x32xf32>
    %206 = vector.extract_strided_slice %203 {offsets = [0, 0], sizes = [8, 32], strides = [1, 1]} : vector<8x96xf32> to vector<8x32xf32>
    %207 = vector.extract_strided_slice %203 {offsets = [0, 32], sizes = [8, 32], strides = [1, 1]} : vector<8x96xf32> to vector<8x32xf32>
    %208 = vector.extract_strided_slice %203 {offsets = [0, 64], sizes = [8, 32], strides = [1, 1]} : vector<8x96xf32> to vector<8x32xf32>
    %209 = arith.mulf %207, %185 : vector<8x32xf32>
    %210 = arith.mulf %206, %205 : vector<8x32xf32>
    %211 = arith.addf %209, %210 : vector<8x32xf32>
    %212 = math.tanh %211 : vector<8x32xf32>
    %213 = arith.mulf %208, %212 : vector<8x32xf32>
    %214 = arith.index_cast %191 : i32 to index
    %c0_62 = arith.constant 0 : index
    %215 = vector.load %arg9[%214, %c0_62] : memref<64x32xf32, #tpu.memory_space<vmem>>, vector<8x32xf32>
    tpu.vector_store %arg9[%214, %c0_62], %213 {strides = array<i32>} : memref<64x32xf32, #tpu.memory_space<vmem>>, vector<8x32xf32>,
    %c8_i32_63 = arith.constant 8 : i32
    %c0_64 = arith.constant 0 : index
    %c0_65 = arith.constant 0 : index
    %216 = vector.load %arg9[%c0_64, %c0_65] : memref<64x32xf32, #tpu.memory_space<vmem>>, vector<64x32xf32>
    %c0_66 = arith.constant 0 : index
    %c0_67 = arith.constant 0 : index
    %217 = vector.load %arg4[%c0_66, %c0_67] : memref<32x128xf32, #tpu.memory_space<vmem>>, vector<32x128xf32>
    %cst_68 = arith.constant dense<0.000000e+00> : vector<64x128xf32>
    %218 = tpu.matmul %216, %217, %cst_68 {dimension_numbers = #tpu.dot_dimension_numbers<[1], [0], [0], [1], [0, 0, 1, 1], [], []>, precision = #tpu.contract_precision<fp32>} : vector<64x32xf32>, vector<32x128xf32>, vector<64x128xf32> -> vector<64x128xf32>
    %c0_69 = arith.constant 0 : index
    %c0_70 = arith.constant 0 : index
    %219 = vector.load %arg6[%c0_69, %c0_70] : memref<1x128xf32, #tpu.memory_space<vmem>>, vector<1x128xf32>
    %220 = vector.broadcast %219 : vector<1x128xf32> to vector<64x128xf32>
    %221 = arith.addf %218, %220 : vector<64x128xf32>
    %c0_71 = arith.constant 0 : index
    %c0_72 = arith.constant 0 : index
    %222 = vector.load %arg10[%c0_71, %c0_72] : memref<64x128xf32, #tpu.memory_space<vmem>>, vector<64x128xf32>
    tpu.vector_store %arg10[%c0_71, %c0_72], %221 {strides = array<i32>} : memref<64x128xf32, #tpu.memory_space<vmem>>, vector<64x128xf32>,
    %cst_73 = arith.constant 0.000000e+00 : f32
    %223 = vector.broadcast %cst_73 : f32 to vector<8x32xf32>
    %c0_i32_74 = arith.constant 0 : i32
    %c8_i32_75 = arith.constant 8 : i32
    %224 = arith.muli %c0_i32_74, %c8_i32_75 : i32
    %225 = tpu.assume_multiple %224, 8 : i32
    %226 = arith.index_cast %225 : i32 to index
    %c0_76 = arith.constant 0 : index
    %227 = vector.load %arg10[%226, %c0_76] : memref<64x128xf32, #tpu.memory_space<vmem>>, vector<8x128xf32>
    %228 = arith.truncf %223 : vector<8x32xf32> to vector<8x32xbf16>
    %c0_77 = arith.constant 0 : index
    %c0_78 = arith.constant 0 : index
    %229 = vector.load %arg5[%c0_77, %c0_78] : memref<32x128xbf16, #tpu.memory_space<vmem>>, vector<32x128xbf16>
    %cst_79 = arith.constant dense<0.000000e+00> : vector<8x128xf32>
    %230 = tpu.matmul %228, %229, %cst_79 {dimension_numbers = #tpu.dot_dimension_numbers<[1], [0], [0], [1], [0, 0, 1, 1], [], []>} : vector<8x32xbf16>, vector<32x128xbf16>, vector<8x128xf32> -> vector<8x128xf32>
    %231 = arith.addf %227, %230 : vector<8x128xf32>
    %232 = vector.extract_strided_slice %231 {offsets = [0, 0], sizes = [8, 96], strides = [1, 1]} : vector<8x128xf32> to vector<8x96xf32>
    %233 = arith.negf %232 : vector<8x96xf32>
    %234 = math.exp %233 : vector<8x96xf32>
    %cst_80 = arith.constant 1.000000e+00 : f32
    %235 = vector.broadcast %cst_80 : f32 to vector<8x96xf32>
    %236 = arith.addf %235, %234 : vector<8x96xf32>
    %237 = arith.divf %235, %236 : vector<8x96xf32>
    %238 = vector.extract_strided_slice %231 {offsets = [0, 96], sizes = [8, 32], strides = [1, 1]} : vector<8x128xf32> to vector<8x32xf32>
    %239 = math.tanh %238 : vector<8x32xf32>
    %240 = vector.extract_strided_slice %237 {offsets = [0, 0], sizes = [8, 32], strides = [1, 1]} : vector<8x96xf32> to vector<8x32xf32>
    %241 = vector.extract_strided_slice %237 {offsets = [0, 32], sizes = [8, 32], strides = [1, 1]} : vector<8x96xf32> to vector<8x32xf32>
    %242 = vector.extract_strided_slice %237 {offsets = [0, 64], sizes = [8, 32], strides = [1, 1]} : vector<8x96xf32> to vector<8x32xf32>
    %243 = arith.mulf %241, %223 : vector<8x32xf32>
    %244 = arith.mulf %240, %239 : vector<8x32xf32>
    %245 = arith.addf %243, %244 : vector<8x32xf32>
    %246 = math.tanh %245 : vector<8x32xf32>
    %247 = arith.mulf %242, %246 : vector<8x32xf32>
    %c1_i32_81 = arith.constant 1 : i32
    %c8_i32_82 = arith.constant 8 : i32
    %248 = arith.muli %c1_i32_81, %c8_i32_82 : i32
    %249 = tpu.assume_multiple %248, 8 : i32
    %250 = arith.index_cast %249 : i32 to index
    %c0_83 = arith.constant 0 : index
    %251 = vector.load %arg10[%250, %c0_83] : memref<64x128xf32, #tpu.memory_space<vmem>>, vector<8x128xf32>
    %252 = arith.truncf %247 : vector<8x32xf32> to vector<8x32xbf16>
    %c0_84 = arith.constant 0 : index
    %c0_85 = arith.constant 0 : index
    %253 = vector.load %arg5[%c0_84, %c0_85] : memref<32x128xbf16, #tpu.memory_space<vmem>>, vector<32x128xbf16>
    %cst_86 = arith.constant dense<0.000000e+00> : vector<8x128xf32>
    %254 = tpu.matmul %252, %253, %cst_86 {dimension_numbers = #tpu.dot_dimension_numbers<[1], [0], [0], [1], [0, 0, 1, 1], [], []>} : vector<8x32xbf16>, vector<32x128xbf16>, vector<8x128xf32> -> vector<8x128xf32>
    %255 = arith.addf %251, %254 : vector<8x128xf32>
    %256 = vector.extract_strided_slice %255 {offsets = [0, 0], sizes = [8, 96], strides = [1, 1]} : vector<8x128xf32> to vector<8x96xf32>
    %257 = arith.negf %256 : vector<8x96xf32>
    %258 = math.exp %257 : vector<8x96xf32>
    %cst_87 = arith.constant 1.000000e+00 : f32
    %259 = vector.broadcast %cst_87 : f32 to vector<8x96xf32>
    %260 = arith.addf %259, %258 : vector<8x96xf32>
    %261 = arith.divf %259, %260 : vector<8x96xf32>
    %262 = vector.extract_strided_slice %255 {offsets = [0, 96], sizes = [8, 32], strides = [1, 1]} : vector<8x128xf32> to vector<8x32xf32>
    %263 = math.tanh %262 : vector<8x32xf32>
    %264 = vector.extract_strided_slice %261 {offsets = [0, 0], sizes = [8, 32], strides = [1, 1]} : vector<8x96xf32> to vector<8x32xf32>
    %265 = vector.extract_strided_slice %261 {offsets = [0, 32], sizes = [8, 32], strides = [1, 1]} : vector<8x96xf32> to vector<8x32xf32>
    %266 = vector.extract_strided_slice %261 {offsets = [0, 64], sizes = [8, 32], strides = [1, 1]} : vector<8x96xf32> to vector<8x32xf32>
    %267 = arith.mulf %265, %245 : vector<8x32xf32>
    %268 = arith.mulf %264, %263 : vector<8x32xf32>
    %269 = arith.addf %267, %268 : vector<8x32xf32>
    %270 = math.tanh %269 : vector<8x32xf32>
    %271 = arith.mulf %266, %270 : vector<8x32xf32>
    %c2_i32_88 = arith.constant 2 : i32
    %c8_i32_89 = arith.constant 8 : i32
    %272 = arith.muli %c2_i32_88, %c8_i32_89 : i32
    %273 = tpu.assume_multiple %272, 8 : i32
    %274 = arith.index_cast %273 : i32 to index
    %c0_90 = arith.constant 0 : index
    %275 = vector.load %arg10[%274, %c0_90] : memref<64x128xf32, #tpu.memory_space<vmem>>, vector<8x128xf32>
    %276 = arith.truncf %271 : vector<8x32xf32> to vector<8x32xbf16>
    %c0_91 = arith.constant 0 : index
    %c0_92 = arith.constant 0 : index
    %277 = vector.load %arg5[%c0_91, %c0_92] : memref<32x128xbf16, #tpu.memory_space<vmem>>, vector<32x128xbf16>
    %cst_93 = arith.constant dense<0.000000e+00> : vector<8x128xf32>
    %278 = tpu.matmul %276, %277, %cst_93 {dimension_numbers = #tpu.dot_dimension_numbers<[1], [0], [0], [1], [0, 0, 1, 1], [], []>} : vector<8x32xbf16>, vector<32x128xbf16>, vector<8x128xf32> -> vector<8x128xf32>
    %279 = arith.addf %275, %278 : vector<8x128xf32>
    %280 = vector.extract_strided_slice %279 {offsets = [0, 0], sizes = [8, 96], strides = [1, 1]} : vector<8x128xf32> to vector<8x96xf32>
    %281 = arith.negf %280 : vector<8x96xf32>
    %282 = math.exp %281 : vector<8x96xf32>
    %cst_94 = arith.constant 1.000000e+00 : f32
    %283 = vector.broadcast %cst_94 : f32 to vector<8x96xf32>
    %284 = arith.addf %283, %282 : vector<8x96xf32>
    %285 = arith.divf %283, %284 : vector<8x96xf32>
    %286 = vector.extract_strided_slice %279 {offsets = [0, 96], sizes = [8, 32], strides = [1, 1]} : vector<8x128xf32> to vector<8x32xf32>
    %287 = math.tanh %286 : vector<8x32xf32>
    %288 = vector.extract_strided_slice %285 {offsets = [0, 0], sizes = [8, 32], strides = [1, 1]} : vector<8x96xf32> to vector<8x32xf32>
    %289 = vector.extract_strided_slice %285 {offsets = [0, 32], sizes = [8, 32], strides = [1, 1]} : vector<8x96xf32> to vector<8x32xf32>
    %290 = vector.extract_strided_slice %285 {offsets = [0, 64], sizes = [8, 32], strides = [1, 1]} : vector<8x96xf32> to vector<8x32xf32>
    %291 = arith.mulf %289, %269 : vector<8x32xf32>
    %292 = arith.mulf %288, %287 : vector<8x32xf32>
    %293 = arith.addf %291, %292 : vector<8x32xf32>
    %294 = math.tanh %293 : vector<8x32xf32>
    %295 = arith.mulf %290, %294 : vector<8x32xf32>
    %c3_i32_95 = arith.constant 3 : i32
    %c8_i32_96 = arith.constant 8 : i32
    %296 = arith.muli %c3_i32_95, %c8_i32_96 : i32
    %297 = tpu.assume_multiple %296, 8 : i32
    %298 = arith.index_cast %297 : i32 to index
    %c0_97 = arith.constant 0 : index
    %299 = vector.load %arg10[%298, %c0_97] : memref<64x128xf32, #tpu.memory_space<vmem>>, vector<8x128xf32>
    %300 = arith.truncf %295 : vector<8x32xf32> to vector<8x32xbf16>
    %c0_98 = arith.constant 0 : index
    %c0_99 = arith.constant 0 : index
    %301 = vector.load %arg5[%c0_98, %c0_99] : memref<32x128xbf16, #tpu.memory_space<vmem>>, vector<32x128xbf16>
    %cst_100 = arith.constant dense<0.000000e+00> : vector<8x128xf32>
    %302 = tpu.matmul %300, %301, %cst_100 {dimension_numbers = #tpu.dot_dimension_numbers<[1], [0], [0], [1], [0, 0, 1, 1], [], []>} : vector<8x32xbf16>, vector<32x128xbf16>, vector<8x128xf32> -> vector<8x128xf32>
    %303 = arith.addf %299, %302 : vector<8x128xf32>
    %304 = vector.extract_strided_slice %303 {offsets = [0, 0], sizes = [8, 96], strides = [1, 1]} : vector<8x128xf32> to vector<8x96xf32>
    %305 = arith.negf %304 : vector<8x96xf32>
    %306 = math.exp %305 : vector<8x96xf32>
    %cst_101 = arith.constant 1.000000e+00 : f32
    %307 = vector.broadcast %cst_101 : f32 to vector<8x96xf32>
    %308 = arith.addf %307, %306 : vector<8x96xf32>
    %309 = arith.divf %307, %308 : vector<8x96xf32>
    %310 = vector.extract_strided_slice %303 {offsets = [0, 96], sizes = [8, 32], strides = [1, 1]} : vector<8x128xf32> to vector<8x32xf32>
    %311 = math.tanh %310 : vector<8x32xf32>
    %312 = vector.extract_strided_slice %309 {offsets = [0, 0], sizes = [8, 32], strides = [1, 1]} : vector<8x96xf32> to vector<8x32xf32>
    %313 = vector.extract_strided_slice %309 {offsets = [0, 32], sizes = [8, 32], strides = [1, 1]} : vector<8x96xf32> to vector<8x32xf32>
    %314 = vector.extract_strided_slice %309 {offsets = [0, 64], sizes = [8, 32], strides = [1, 1]} : vector<8x96xf32> to vector<8x32xf32>
    %315 = arith.mulf %313, %293 : vector<8x32xf32>
    %316 = arith.mulf %312, %311 : vector<8x32xf32>
    %317 = arith.addf %315, %316 : vector<8x32xf32>
    %318 = math.tanh %317 : vector<8x32xf32>
    %319 = arith.mulf %314, %318 : vector<8x32xf32>
    %c4_i32_102 = arith.constant 4 : i32
    %c8_i32_103 = arith.constant 8 : i32
    %320 = arith.muli %c4_i32_102, %c8_i32_103 : i32
    %321 = tpu.assume_multiple %320, 8 : i32
    %322 = arith.index_cast %321 : i32 to index
    %c0_104 = arith.constant 0 : index
    %323 = vector.load %arg10[%322, %c0_104] : memref<64x128xf32, #tpu.memory_space<vmem>>, vector<8x128xf32>
    %324 = arith.truncf %319 : vector<8x32xf32> to vector<8x32xbf16>
    %c0_105 = arith.constant 0 : index
    %c0_106 = arith.constant 0 : index
    %325 = vector.load %arg5[%c0_105, %c0_106] : memref<32x128xbf16, #tpu.memory_space<vmem>>, vector<32x128xbf16>
    %cst_107 = arith.constant dense<0.000000e+00> : vector<8x128xf32>
    %326 = tpu.matmul %324, %325, %cst_107 {dimension_numbers = #tpu.dot_dimension_numbers<[1], [0], [0], [1], [0, 0, 1, 1], [], []>} : vector<8x32xbf16>, vector<32x128xbf16>, vector<8x128xf32> -> vector<8x128xf32>
    %327 = arith.addf %323, %326 : vector<8x128xf32>
    %328 = vector.extract_strided_slice %327 {offsets = [0, 0], sizes = [8, 96], strides = [1, 1]} : vector<8x128xf32> to vector<8x96xf32>
    %329 = arith.negf %328 : vector<8x96xf32>
    %330 = math.exp %329 : vector<8x96xf32>
    %cst_108 = arith.constant 1.000000e+00 : f32
    %331 = vector.broadcast %cst_108 : f32 to vector<8x96xf32>
    %332 = arith.addf %331, %330 : vector<8x96xf32>
    %333 = arith.divf %331, %332 : vector<8x96xf32>
    %334 = vector.extract_strided_slice %327 {offsets = [0, 96], sizes = [8, 32], strides = [1, 1]} : vector<8x128xf32> to vector<8x32xf32>
    %335 = math.tanh %334 : vector<8x32xf32>
    %336 = vector.extract_strided_slice %333 {offsets = [0, 0], sizes = [8, 32], strides = [1, 1]} : vector<8x96xf32> to vector<8x32xf32>
    %337 = vector.extract_strided_slice %333 {offsets = [0, 32], sizes = [8, 32], strides = [1, 1]} : vector<8x96xf32> to vector<8x32xf32>
    %338 = vector.extract_strided_slice %333 {offsets = [0, 64], sizes = [8, 32], strides = [1, 1]} : vector<8x96xf32> to vector<8x32xf32>
    %339 = arith.mulf %337, %317 : vector<8x32xf32>
    %340 = arith.mulf %336, %335 : vector<8x32xf32>
    %341 = arith.addf %339, %340 : vector<8x32xf32>
    %342 = math.tanh %341 : vector<8x32xf32>
    %343 = arith.mulf %338, %342 : vector<8x32xf32>
    %c5_i32_109 = arith.constant 5 : i32
    %c8_i32_110 = arith.constant 8 : i32
    %344 = arith.muli %c5_i32_109, %c8_i32_110 : i32
    %345 = tpu.assume_multiple %344, 8 : i32
    %346 = arith.index_cast %345 : i32 to index
    %c0_111 = arith.constant 0 : index
    %347 = vector.load %arg10[%346, %c0_111] : memref<64x128xf32, #tpu.memory_space<vmem>>, vector<8x128xf32>
    %348 = arith.truncf %343 : vector<8x32xf32> to vector<8x32xbf16>
    %c0_112 = arith.constant 0 : index
    %c0_113 = arith.constant 0 : index
    %349 = vector.load %arg5[%c0_112, %c0_113] : memref<32x128xbf16, #tpu.memory_space<vmem>>, vector<32x128xbf16>
    %cst_114 = arith.constant dense<0.000000e+00> : vector<8x128xf32>
    %350 = tpu.matmul %348, %349, %cst_114 {dimension_numbers = #tpu.dot_dimension_numbers<[1], [0], [0], [1], [0, 0, 1, 1], [], []>} : vector<8x32xbf16>, vector<32x128xbf16>, vector<8x128xf32> -> vector<8x128xf32>
    %351 = arith.addf %347, %350 : vector<8x128xf32>
    %352 = vector.extract_strided_slice %351 {offsets = [0, 0], sizes = [8, 96], strides = [1, 1]} : vector<8x128xf32> to vector<8x96xf32>
    %353 = arith.negf %352 : vector<8x96xf32>
    %354 = math.exp %353 : vector<8x96xf32>
    %cst_115 = arith.constant 1.000000e+00 : f32
    %355 = vector.broadcast %cst_115 : f32 to vector<8x96xf32>
    %356 = arith.addf %355, %354 : vector<8x96xf32>
    %357 = arith.divf %355, %356 : vector<8x96xf32>
    %358 = vector.extract_strided_slice %351 {offsets = [0, 96], sizes = [8, 32], strides = [1, 1]} : vector<8x128xf32> to vector<8x32xf32>
    %359 = math.tanh %358 : vector<8x32xf32>
    %360 = vector.extract_strided_slice %357 {offsets = [0, 0], sizes = [8, 32], strides = [1, 1]} : vector<8x96xf32> to vector<8x32xf32>
    %361 = vector.extract_strided_slice %357 {offsets = [0, 32], sizes = [8, 32], strides = [1, 1]} : vector<8x96xf32> to vector<8x32xf32>
    %362 = vector.extract_strided_slice %357 {offsets = [0, 64], sizes = [8, 32], strides = [1, 1]} : vector<8x96xf32> to vector<8x32xf32>
    %363 = arith.mulf %361, %341 : vector<8x32xf32>
    %364 = arith.mulf %360, %359 : vector<8x32xf32>
    %365 = arith.addf %363, %364 : vector<8x32xf32>
    %366 = math.tanh %365 : vector<8x32xf32>
    %367 = arith.mulf %362, %366 : vector<8x32xf32>
    %c6_i32_116 = arith.constant 6 : i32
    %c8_i32_117 = arith.constant 8 : i32
    %368 = arith.muli %c6_i32_116, %c8_i32_117 : i32
    %369 = tpu.assume_multiple %368, 8 : i32
    %370 = arith.index_cast %369 : i32 to index
    %c0_118 = arith.constant 0 : index
    %371 = vector.load %arg10[%370, %c0_118] : memref<64x128xf32, #tpu.memory_space<vmem>>, vector<8x128xf32>
    %372 = arith.truncf %367 : vector<8x32xf32> to vector<8x32xbf16>
    %c0_119 = arith.constant 0 : index
    %c0_120 = arith.constant 0 : index
    %373 = vector.load %arg5[%c0_119, %c0_120] : memref<32x128xbf16, #tpu.memory_space<vmem>>, vector<32x128xbf16>
    %cst_121 = arith.constant dense<0.000000e+00> : vector<8x128xf32>
    %374 = tpu.matmul %372, %373, %cst_121 {dimension_numbers = #tpu.dot_dimension_numbers<[1], [0], [0], [1], [0, 0, 1, 1], [], []>} : vector<8x32xbf16>, vector<32x128xbf16>, vector<8x128xf32> -> vector<8x128xf32>
    %375 = arith.addf %371, %374 : vector<8x128xf32>
    %376 = vector.extract_strided_slice %375 {offsets = [0, 0], sizes = [8, 96], strides = [1, 1]} : vector<8x128xf32> to vector<8x96xf32>
    %377 = arith.negf %376 : vector<8x96xf32>
    %378 = math.exp %377 : vector<8x96xf32>
    %cst_122 = arith.constant 1.000000e+00 : f32
    %379 = vector.broadcast %cst_122 : f32 to vector<8x96xf32>
    %380 = arith.addf %379, %378 : vector<8x96xf32>
    %381 = arith.divf %379, %380 : vector<8x96xf32>
    %382 = vector.extract_strided_slice %375 {offsets = [0, 96], sizes = [8, 32], strides = [1, 1]} : vector<8x128xf32> to vector<8x32xf32>
    %383 = math.tanh %382 : vector<8x32xf32>
    %384 = vector.extract_strided_slice %381 {offsets = [0, 0], sizes = [8, 32], strides = [1, 1]} : vector<8x96xf32> to vector<8x32xf32>
    %385 = vector.extract_strided_slice %381 {offsets = [0, 32], sizes = [8, 32], strides = [1, 1]} : vector<8x96xf32> to vector<8x32xf32>
    %386 = vector.extract_strided_slice %381 {offsets = [0, 64], sizes = [8, 32], strides = [1, 1]} : vector<8x96xf32> to vector<8x32xf32>
    %387 = arith.mulf %385, %365 : vector<8x32xf32>
    %388 = arith.mulf %384, %383 : vector<8x32xf32>
    %389 = arith.addf %387, %388 : vector<8x32xf32>
    %390 = math.tanh %389 : vector<8x32xf32>
    %391 = arith.mulf %386, %390 : vector<8x32xf32>
    %c7_i32_123 = arith.constant 7 : i32
    %c8_i32_124 = arith.constant 8 : i32
    %392 = arith.muli %c7_i32_123, %c8_i32_124 : i32
    %393 = tpu.assume_multiple %392, 8 : i32
    %394 = arith.index_cast %393 : i32 to index
    %c0_125 = arith.constant 0 : index
    %395 = vector.load %arg10[%394, %c0_125] : memref<64x128xf32, #tpu.memory_space<vmem>>, vector<8x128xf32>
    %396 = arith.truncf %391 : vector<8x32xf32> to vector<8x32xbf16>
    %c0_126 = arith.constant 0 : index
    %c0_127 = arith.constant 0 : index
    %397 = vector.load %arg5[%c0_126, %c0_127] : memref<32x128xbf16, #tpu.memory_space<vmem>>, vector<32x128xbf16>
    %cst_128 = arith.constant dense<0.000000e+00> : vector<8x128xf32>
    %398 = tpu.matmul %396, %397, %cst_128 {dimension_numbers = #tpu.dot_dimension_numbers<[1], [0], [0], [1], [0, 0, 1, 1], [], []>} : vector<8x32xbf16>, vector<32x128xbf16>, vector<8x128xf32> -> vector<8x128xf32>
    %399 = arith.addf %395, %398 : vector<8x128xf32>
    %400 = vector.extract_strided_slice %399 {offsets = [0, 0], sizes = [8, 96], strides = [1, 1]} : vector<8x128xf32> to vector<8x96xf32>
    %401 = arith.negf %400 : vector<8x96xf32>
    %402 = math.exp %401 : vector<8x96xf32>
    %cst_129 = arith.constant 1.000000e+00 : f32
    %403 = vector.broadcast %cst_129 : f32 to vector<8x96xf32>
    %404 = arith.addf %403, %402 : vector<8x96xf32>
    %405 = arith.divf %403, %404 : vector<8x96xf32>
    %406 = vector.extract_strided_slice %399 {offsets = [0, 96], sizes = [8, 32], strides = [1, 1]} : vector<8x128xf32> to vector<8x32xf32>
    %407 = math.tanh %406 : vector<8x32xf32>
    %408 = vector.extract_strided_slice %405 {offsets = [0, 0], sizes = [8, 32], strides = [1, 1]} : vector<8x96xf32> to vector<8x32xf32>
    %409 = vector.extract_strided_slice %405 {offsets = [0, 32], sizes = [8, 32], strides = [1, 1]} : vector<8x96xf32> to vector<8x32xf32>
    %410 = vector.extract_strided_slice %405 {offsets = [0, 64], sizes = [8, 32], strides = [1, 1]} : vector<8x96xf32> to vector<8x32xf32>
    %411 = arith.mulf %409, %389 : vector<8x32xf32>
    %412 = arith.mulf %408, %407 : vector<8x32xf32>
    %413 = arith.addf %411, %412 : vector<8x32xf32>
    %414 = math.tanh %413 : vector<8x32xf32>
    %415 = arith.mulf %410, %414 : vector<8x32xf32>
    %c8_i32_130 = arith.constant 8 : i32
    %c0_131 = arith.constant 0 : index
    %c0_132 = arith.constant 0 : index
    %416 = vector.load %arg7[%c0_131, %c0_132] : memref<1x33xf32, #tpu.memory_space<vmem>>, vector<1x32xf32>
    %c0_133 = arith.constant 0 : index
    %c32 = arith.constant 32 : index
    %417 = vector.load %arg7[%c0_133, %c32] : memref<1x33xf32, #tpu.memory_space<vmem>>, vector<1x1xf32>
    %418 = vector.broadcast %416 : vector<1x32xf32> to vector<8x32xf32>
    %419 = arith.mulf %415, %418 : vector<8x32xf32>
    %cst_134 = arith.constant dense<0.000000e+00> : vector<8xf32>
    %420 = vector.multi_reduction <add>, %419, %cst_134 [1] : vector<8x32xf32> to vector<8xf32>
    %421 = vector.shape_cast %420 : vector<8xf32> to vector<8x1xf32>
    %422 = vector.broadcast %417 : vector<1x1xf32> to vector<8x1xf32>
    %423 = arith.addf %421, %422 : vector<8x1xf32>
    %c0_135 = arith.constant 0 : index
    %c0_136 = arith.constant 0 : index
    %424 = vector.load %arg8[%c0_135, %c0_136] : memref<8x1xf32, #tpu.memory_space<vmem>>, vector<8x1xf32>
    tpu.vector_store %arg8[%c0_135, %c0_136], %423 {strides = array<i32>} : memref<8x1xf32, #tpu.memory_space<vmem>>, vector<8x1xf32>,
    return
  }
}

</mosaic_0001>

<bundles_post_ra>
// kernel: forward.1
= control target key start
LH: loop header
LB: loop body
LE: loop exit
PB: predicated region body
PF: predicated region fallthrough
CT: control target
= control target key end

     0   :  { %13 = vsyncpa [#allocation5], 0  ;;  %s2966_s0 = inlined_call_operand.hbm [shape: f32[64,8], index: 0, kind: input, shape index: {}]   ;;  %s2967_s1 = inlined_call_operand.hbm [shape: f32[8,128], index: 1, kind: input, shape index: {}]   ;;  %s2968_s2 = inlined_call_operand.hbm [shape: bf16[32,128], index: 2, kind: input, shape index: {}]   ;;  %s2969_s3 = inlined_call_operand.vmem [shape: f32[1,128], index: 3, kind: input, shape index: {}]   ;;  %s2970_s4 = inlined_call_operand.hbm [shape: f32[32,128], index: 4, kind: input, shape index: {}]   ;;  %s2971_s5 = inlined_call_operand.hbm [shape: bf16[32,128], index: 5, kind: input, shape index: {}]   ;;  %s2972_s6 = inlined_call_operand.vmem [shape: f32[1,128], index: 6, kind: input, shape index: {}]   ;;  %s2973_s7 = inlined_call_operand.vmem [shape: f32[1,33], index: 7, kind: input, shape index: {}]   ;;  %s2974_s8 = inlined_call_operand.vmem [shape: f32[8,1], index: 8, kind: output, shape index: {}]  }
   0x1   :  { %14 = vsyncpa [#allocation7], 0  ;;  %s34_s29 = sshll.u32 %s2967_s1, 4  ;;  %s35_s29 = int_to_ptr.hbm [resolvable:$true] %s34_s29 }
   0x2   :  { %15 = vsyncpa [#allocation10], 0  ;;  %s2515_s30 = smov [#allocation6]   ;;  %s59_s12 = sshll.u32 %s2970_s4, 4  ;;  %s60_s12 = int_to_ptr.hbm [resolvable:$true] %s59_s12 }
   0x3   :  { %s36_s9 = sshll.u32 %s2515_s30, 4  ;;  %s2516_s13 = smov [#allocation9]   ;;  %s37_s9 = int_to_ptr.vmem [resolvable:$true] %s36_s9 }
   0x4   :  { %39 = dma.hbm_to_vmem [thread:$0]  %s35_s29, 128, %s37_s9, [#allocation7]  }
   0x5   :  { %s61_s14 = sshll.u32 %s2516_s13, 4  ;;  %s20_s17 = sshll.u32 %s2966_s0, 4  ;;  %s62_s14 = int_to_ptr.vmem [resolvable:$true] %s61_s14  ;;  %s21_s17 = int_to_ptr.hbm [resolvable:$true] %s20_s17 }
   0x6   :  { %s2517_s1 = smov 128   ;;  %s2518_s18 = smov 8  }
   0x7   :  { %67 = dma.hbm_to_vmem [thread:$0]  %s60_s12, 512, %s62_s14, [#allocation10], %s2517_s1, %s2517_s1, %s2518_s18  }
   0x8   :  { %s44_s21 = sshll.u32 %s2968_s2, 4  ;;  %s2519_s22 = smov [#allocation4]   ;;  %s45_s21 = int_to_ptr.hbm [resolvable:$true] %s44_s21 }
   0x9   :  { %s22_s23 = sshll.u32 %s2519_s22, 4  ;;  %s2520_s4 = smov [#allocation8]   ;;  %s23_s23 = int_to_ptr.vmem [resolvable:$true] %s22_s23 }
   0xa   :  { %28 = dma.hbm_to_vmem [thread:$0]  %s21_s17, 1024, %s23_s23, [#allocation5], %s2517_s1, %s2517_s1, %s2518_s18  }
   0xb   :  { %s46_s24 = sshll.u32 %s2520_s4, 4  ;;  %s2521_s25 = smov 64   ;;  %s47_s24 = int_to_ptr.vmem [resolvable:$true] %s46_s24 }
   0xc   :  { %s2522_s26 = smov 4   ;;  %s72_s28 = sshll.u32 %s2971_s5, 4  ;;  %s73_s28 = int_to_ptr.hbm [resolvable:$true] %s72_s28 }
   0xd   :  { %52 = dma.hbm_to_vmem [thread:$0]  %s45_s21, 256, %s47_s24, [#allocation7], %s2521_s25, %s2521_s25, %s2522_s26  }
   0xe   :  { %s2523_s29 = smov [#allocation11]  }
   0xf   :  { %s74_s2 = sshll.u32 %s2523_s29, 4  ;;  %s75_s2 = int_to_ptr.vmem [resolvable:$true] %s74_s2 }
  0x10   :  { %80 = dma.hbm_to_vmem [thread:$0]  %s73_s28, 256, %s75_s2, [#allocation10], %s2521_s25, %s2521_s25, %s2522_s26  }
  0x11   :  { %2509 = dma.done.wait [#allocation5], 1024  }
  0x12   :  { %2510 = vsyncadd [#allocation5], 4294966272 }
  0x13   :  { %2511 = dma.done.wait [#allocation7], 384  }
  0x14   :  { %2512 = vsyncadd [#allocation7], 4294966912 }
  0x15   :  { %2513 = dma.done.wait [#allocation10], 768  }
  0x16   :  { %2514 = vsyncadd [#allocation10], 4294966528  ;;  %vm119_vm0 = vcmask 64512   ;;  %v114_v0 = vld [vmem:[#allocation6] sm:$0xff]  ;;  %v107_v4 = vld [vmem:[#allocation4 + $0x8] sm:$0xff]  ;;  %vm532_vm5 = vcmask 261120  }
  0x17   :  { %v106_v1 = vld [vmem:[#allocation4] sm:$0xff]  ;;  %v159_v2 = vand.u32 4294901760, %v114_v0  ;;  %v124_v6 = vsel %vm119_vm0, %v107_v4, 0  ;;  %v108_v7 = vld [vmem:[#allocation4 + $0x10] sm:$0xff]  ;;  %v2228_v17 = vld [vmem:[#allocation8] sm:$0xff] }
  0x18   :  { %v121_v3 = vsel %vm119_vm0, %v106_v1, 0  ;;  %v2229_v9 = vld [vmem:[#allocation8 + $0x8] sm:$0xff]  ;;  %v2595_v10 = vand.u32 4294901760, %v124_v6  ;;  %v127_v14 = vsel %vm119_vm0, %v108_v7, 0  ;;  %v109_v23 = vld [vmem:[#allocation4 + $0x18] sm:$0xff]  ;;  %v110_v30 = vld [vmem:[#allocation4 + $0x20] sm:$0xff] }
  0x19   :  { %v2592_v5 = vand.u32 4294901760, %v121_v3  ;;  %v242_v8 = vsub.f32 %v114_v0, %v159_v2  ;;  %160 = vmatpush.msra.mxu0 %v159_v2  ;;  %355 = vmatpush.msra.mxu3 %v159_v2  ;;  %v2600_v20 = vand.u32 4294901760, %v127_v14  ;;  %v130_v26 = vsel %vm119_vm0, %v109_v23, 0  ;;  %v111_v37 = vld [vmem:[#allocation4 + $0x28] sm:$0xff]  ;;  %v112_v44 = vld [vmem:[#allocation4 + $0x30] sm:$0xff]  ;;  %v113_v51 = vld [vmem:[#allocation4 + $0x38] sm:$0xff] }
  0x1a   :  { %v170_v13 = vsub.f32 %v124_v6, %v2595_v10  ;;  %v2605_v29 = vand.u32 4294901760, %v130_v26  ;;  %v133_v33 = vsel %vm119_vm0, %v110_v30, 0  ;;  %v136_v40 = vsel %vm119_vm0, %v111_v37, 0 }
  0x1b   :  { %v162_v11 = vsub.f32 %v121_v3, %v2592_v5  ;;  %297 = vmatpush.msra.mxu2 %v242_v8  ;;  %v243_v12 = vand.u32 4294901760, %v242_v8  ;;  %v178_v25 = vsub.f32 %v127_v14, %v2600_v20  ;;  %v193_v36 = vand.u32 4294901760, %v133_v33 }
  0x1c   :  { %v171_v19 = vand.u32 4294901760, %v170_v13  ;;  %v186_v32 = vsub.f32 %v130_v26, %v2605_v29  ;;  %v201_v43 = vand.u32 4294901760, %v136_v40  ;;  %v139_v47 = vsel %vm119_vm0, %v112_v44, 0 }
  0x1d   :  { %300 = vmatmul.f32.vlgmr.msra.gmra.mxu2 %v162_v11  ;;  %v163_v15 = vand.u32 4294901760, %v162_v11  ;;  %423 = vmatpush.msrb.mxu0 %v243_v12  ;;  %v244_v16 = vsub.f32 %v242_v8, %v243_v12  ;;  %v179_v28 = vand.u32 4294901760, %v178_v25  ;;  %v194_v39 = vsub.f32 %v133_v33, %v193_v36 }
  0x1e   :  { %542 = vmatpush.bf16.msrb.mxu2 %v2229_v9  ;;  %v172_v24 = vsub.f32 %v170_v13, %v171_v19  ;;  %v187_v35 = vand.u32 4294901760, %v186_v32  ;;  %v202_v46 = vsub.f32 %v136_v40, %v201_v43  ;;  %v209_v50 = vand.u32 4294901760, %v139_v47  ;;  %v2635_v9 = vld [vmem:[%s2969_s3] ss:$0 sm:$0xff]  ;;  %s2525_s3 = smov 32  }
  0x1f   :  { %v164_v18 = vsub.f32 %v162_v11, %v163_v15  ;;  %359 = vmatmul.f32.vlgmr.msra.gmra.mxu3 %v163_v15  ;;  %v245_v21 = vand.u32 4294901760, %v244_v16  ;;  %v180_v31 = vsub.f32 %v178_v25, %v179_v28  ;;  %v195_v42 = vand.u32 4294901760, %v194_v39 }
  0x20   :  { %v173_v27 = vand.u32 4294901760, %v172_v24  ;;  %v188_v38 = vsub.f32 %v186_v32, %v187_v35  ;;  %v203_v49 = vand.u32 4294901760, %v202_v46  ;;  %v210_v53 = vsub.f32 %v139_v47, %v209_v50 }
  0x21   :  { %v165_v22 = vand.u32 4294901760, %v164_v18  ;;  %246 = vmatpush.msra.mxu1 %v245_v21  ;;  %v181_v34 = vand.u32 4294901760, %v180_v31  ;;  %v196_v45 = vsub.f32 %v194_v39, %v195_v42  ;;  %v142_v54 = vsel %vm119_vm0, %v113_v51, 0 }
  0x22   :  { %543 = vmatpush.bf16.msrb.mxu2 %v2228_v17  ;;  %248 = vmatmul.f32.vlgmr.msra.gmra.mxu1 %v2592_v5  ;;  %v189_v41 = vand.u32 4294901760, %v188_v38  ;;  %v204_v52 = vsub.f32 %v202_v46, %v203_v49  ;;  %v211_v56 = vand.u32 4294901760, %v210_v53  ;;  %v217_v57 = vand.u32 4294901760, %v142_v54 }
  0x23   :  { %166 = vmatmul.f32.vlgmr.msra.gmra.mxu0 %v165_v22  ;;  %473 = vmatpush.msrb.mxu1 %v159_v2  ;;  %v197_v48 = vand.u32 4294901760, %v196_v45  ;;  %v2524_v0 = vmov 0  }
  0x24   :  { %v205_v55 = vand.u32 4294901760, %v204_v52  ;;  %v212_v58 = vsub.f32 %v210_v53, %v211_v56  ;;  %v218_v59 = vsub.f32 %v142_v54, %v217_v57 }
  0x25   :  { %305 = vmatmul.f32.gmra.mxu2 %v170_v13 }
  0x26   :  { %v213_v60 = vand.u32 4294901760, %v212_v58  ;;  %v219_v61 = vand.u32 4294901760, %v218_v59 }
  0x27   :  { %365 = vmatmul.f32.gmra.mxu3 %v171_v19 }
  0x28   :  { %v220_v62 = vsub.f32 %v218_v59, %v219_v61 }
  0x2a   :  { %252 = vmatmul.f32.gmra.mxu1 %v2595_v10  ;;  %v221_v63 = vand.u32 4294901760, %v220_v62 }
  0x2b   :  { %174 = vmatmul.f32.gmra.mxu0 %v173_v27 }
  0x2d   :  { %310 = vmatmul.f32.gmra.mxu2 %v178_v25 }
  0x2f   :  { %371 = vmatmul.f32.gmra.mxu3 %v179_v28 }
  0x32   :  { %256 = vmatmul.f32.gmra.mxu1 %v2600_v20 }
  0x33   :  { %182 = vmatmul.f32.gmra.mxu0 %v181_v34 }
  0x35   :  { %315 = vmatmul.f32.gmra.mxu2 %v186_v32 }
  0x37   :  { %377 = vmatmul.f32.gmra.mxu3 %v187_v35 }
  0x3a   :  { %260 = vmatmul.f32.gmra.mxu1 %v2605_v29 }
  0x3b   :  { %190 = vmatmul.f32.gmra.mxu0 %v189_v41 }
  0x3d   :  { %320 = vmatmul.f32.gmra.mxu2 %v194_v39 }
  0x3f   :  { %383 = vmatmul.f32.gmra.mxu3 %v195_v42 }
  0x42   :  { %264 = vmatmul.f32.gmra.mxu1 %v193_v36 }
  0x43   :  { %198 = vmatmul.f32.gmra.mxu0 %v197_v48 }
  0x45   :  { %325 = vmatmul.f32.gmra.mxu2 %v202_v46 }
  0x47   :  { %389 = vmatmul.f32.gmra.mxu3 %v203_v49 }
  0x4a   :  { %268 = vmatmul.f32.gmra.mxu1 %v201_v43 }
  0x4b   :  { %206 = vmatmul.f32.gmra.mxu0 %v205_v55 }
  0x4d   :  { %330 = vmatmul.f32.gmra.mxu2 %v210_v53 }
  0x4f   :  { %395 = vmatmul.f32.gmra.mxu3 %v211_v56 }
  0x52   :  { %272 = vmatmul.f32.gmra.mxu1 %v209_v50 }
  0x53   :  { %214 = vmatmul.f32.gmra.mxu0 %v213_v60 }
  0x55   :  { %335 = vmatmul.f32.gmra.mxu2 %v218_v59 }
  0x57   :  { %401 = vmatmul.f32.gmra.mxu3 %v219_v61 }
  0x5a   :  { %276 = vmatmul.f32.gmra.mxu1 %v217_v57 }
  0x5b   :  { %222 = vmatmul.f32.gmra.mxu0 %v221_v63 }
  0x5d   :  { %544 = vmatmul.bf16.vlgmr.msrb.gmra.mxu2 %v2524_v0 }
  0x62   :  { %475 = vmatmul.f32.vlgmr.msrb.gmra.mxu1 %v2592_v5 }
  0x63   :  { %425 = vmatmul.f32.vlgmr.msrb.gmra.mxu0 %v2592_v5 }
  0x6a   :  { %479 = vmatmul.f32.gmra.mxu1 %v2595_v10 }
  0x6b   :  { %429 = vmatmul.f32.gmra.mxu0 %v2595_v10 }
  0x72   :  { %483 = vmatmul.f32.gmra.mxu1 %v2600_v20 }
  0x73   :  { %433 = vmatmul.f32.gmra.mxu0 %v2600_v20 }
  0x7a   :  { %487 = vmatmul.f32.gmra.mxu1 %v2605_v29 }
  0x7b   :  { %437 = vmatmul.f32.gmra.mxu0 %v2605_v29 }
  0x82   :  { %491 = vmatmul.f32.gmra.mxu1 %v193_v36 }
  0x83   :  { %441 = vmatmul.f32.gmra.mxu0 %v193_v36 }
  0x8a   :  { %495 = vmatmul.f32.gmra.mxu1 %v201_v43 }
  0x8b   :  { %445 = vmatmul.f32.gmra.mxu0 %v201_v43 }
  0x92   :  { %499 = vmatmul.f32.gmra.mxu1 %v209_v50 }
  0x93   :  { %449 = vmatmul.f32.gmra.mxu0 %v209_v50 }
  0x9a   :  { %503 = vmatmul.f32.gmra.mxu1 %v217_v57 }
  0x9b   :  { %453 = vmatmul.f32.gmra.mxu0 %v217_v57 }
  0x9f   :  { %v249_v3 = vpop.f32.mrf.mxu1 }
  0xa0   :  { %v167_v1 = vpop.f32.mrf.mxu0  ;;  %v301_v2 = vpop.f32.mrf.mxu2 }
  0xa1   :  { %v168_v38 = vadd.f32 %v2635_v9, %v167_v1 }
  0xa2   :  { %v360_v4 = vpop.f32.mrf.mxu3 }
  0xa3   :  { %v250_v42 = vadd.f32 %v249_v3, %v168_v38 }
  0xa5   :  { %v302_v47 = vadd.f32 %v301_v2, %v250_v42 }
  0xa7   :  { %v2628_v7 = vpop.f32.mrf.mxu1  ;;  %v361_v48 = vadd.f32 %v360_v4, %v302_v47 }
  0xa8   :  { %v2624_v5 = vpop.f32.mrf.mxu0  ;;  %v2626_v6 = vpop.f32.mrf.mxu2 }
  0xaa   :  { %v2630_v8 = vpop.f32.mrf.mxu3 }
  0xaf   :  { %v257_v13 = vpop.f32.mrf.mxu1 }
  0xb0   :  { %v183_v10 = vpop.f32.mrf.mxu0  ;;  %v311_v11 = vpop.f32.mrf.mxu2 }
  0xb1   :  { %v184_v12 = vadd.f32 %v2635_v9, %v183_v10 }
  0xb2   :  { %v372_v14 = vpop.f32.mrf.mxu3 }
  0xb3   :  { %v258_v15 = vadd.f32 %v257_v13, %v184_v12 }
  0xb5   :  { %v312_v16 = vadd.f32 %v311_v11, %v258_v15 }
  0xb7   :  { %v2638_v17 = vadd.f32 %v372_v14, %v312_v16  ;;  %v2644_v20 = vpop.f32.mrf.mxu1 }
  0xb8   :  { %v2640_v18 = vpop.f32.mrf.mxu0  ;;  %v2642_v19 = vpop.f32.mrf.mxu2 }
  0xba   :  { %v2646_v21 = vpop.f32.mrf.mxu3 }
  0xbf   :  { %v265_v25 = vpop.f32.mrf.mxu1 }
  0xc0   :  { %v199_v22 = vpop.f32.mrf.mxu0  ;;  %v321_v23 = vpop.f32.mrf.mxu2 }
  0xc1   :  { %v200_v24 = vadd.f32 %v2635_v9, %v199_v22 }
  0xc2   :  { %v384_v26 = vpop.f32.mrf.mxu3 }
  0xc3   :  { %v266_v27 = vadd.f32 %v265_v25, %v200_v24  ;;  %v2230_v24 = vld [vmem:[#allocation8] sm:$0xff] }
  0xc5   :  { %v322_v28 = vadd.f32 %v321_v23, %v266_v27  ;;  %v2231_v23 = vld [vmem:[#allocation8 + $0x8] sm:$0xff] }
  0xc6   :  { %623 = vmatpush.bf16.msrb.mxu3 %v2231_v23 }
  0xc7   :  { %v2649_v29 = vadd.f32 %v384_v26, %v322_v28  ;;  %v2655_v32 = vpop.f32.mrf.mxu1 }
  0xc8   :  { %v2651_v30 = vpop.f32.mrf.mxu0  ;;  %v2653_v31 = vpop.f32.mrf.mxu2 }
  0xca   :  { %v2657_v33 = vpop.f32.mrf.mxu3  ;;  %624 = vmatpush.bf16.msrb.mxu3 %v2230_v24 }
  0xcf   :  { %v273_v37 = vpop.f32.mrf.mxu1 }
  0xd0   :  { %v215_v34 = vpop.f32.mrf.mxu0  ;;  %v331_v35 = vpop.f32.mrf.mxu2 }
  0xd1   :  { %v216_v36 = vadd.f32 %v2635_v9, %v215_v34  ;;  %v176_v34 = vadd.f32 %v2635_v9, %v2624_v5 }
  0xd2   :  { %v396_v40 = vpop.f32.mrf.mxu3 }
  0xd3   :  { %v274_v39 = vadd.f32 %v273_v37, %v216_v36 }
  0xd5   :  { %v332_v41 = vadd.f32 %v331_v35, %v274_v39  ;;  %v254_v35 = vadd.f32 %v2628_v7, %v176_v34 }
  0xd7   :  { %v2661_v43 = vadd.f32 %v396_v40, %v332_v41  ;;  %v2667_v46 = vpop.f32.mrf.mxu1  ;;  %v307_v36 = vadd.f32 %v2626_v6, %v254_v35 }
  0xd8   :  { %v2663_v44 = vpop.f32.mrf.mxu0  ;;  %v2665_v45 = vpop.f32.mrf.mxu2 }
  0xd9   :  { %v367_v39 = vadd.f32 %v2630_v8, %v307_v36 }
  0xda   :  { %v2682_v37 = vpop.f32.mrf.mxu3 }
  0xdf   :  { %v476_v52 = vpop.f32.mrf.mxu1 }
  0xe0   :  { %v426_v49 = vpop.f32.mrf.mxu0  ;;  %v545_v50 = vpop.f32.mrf.mxu2 }
  0xe1   :  { %v427_v51 = vadd.f32 %v426_v49, %v361_v48 }
  0xe3   :  { %v477_v53 = vadd.f32 %v476_v52, %v427_v51 }
  0xe5   :  { %v549_v54 = vadd.f32 %v545_v50, %v477_v53 }
  0xe7   :  { %2261 = vtanh.f32 %v549_v54  ;;  %v2134_v57 = vmul.f32 -1.442695, %v549_v54  ;;  %v480_v41 = vpop.f32.mrf.mxu1 }
  0xe8   :  { %v547_v55 = vpop.f32.mrf.mxu2  ;;  %v430_v38 = vpop.f32.mrf.mxu0 }
  0xe9   :  { %2263 = vpow2.f32 %v2134_v57  ;;  %v431_v40 = vadd.f32 %v430_v38, %v367_v39 }
  0xeb   :  { %v481_v42 = vadd.f32 %v480_v41, %v431_v40 }
  0xed   :  { %v2262_v56 = vpop.eup %2261 }
  0xee   :  { %572 = vrot.lane.b32.xlu0 %v2262_v56, %s2525_s3 }
  0xef   :  { %v2264_v58 = vpop.eup %2263 }
  0xf0   :  { %v553_v59 = vadd.f32 1.0, %v2264_v58 }
  0xf2   :  { %2265 = vrcp.f32 %v553_v59  ;;  %v565_v2 = vand.u32 2147483648, %v553_v59  ;;  %vm559_vm2 = vweird.f32 %v553_v59  ;;  %v563_v3 = vand.u32 2147483647, %v553_v59 }
  0xf4   :  { %v566_v10 = vor.u32 1.1754944e-38, %v565_v2  ;;  %vm564_vm4 = vcmp.eq.f32.partialorder %v563_v3, 8.507059e+37  ;;  %v2233_v3 = vld [vmem:[#allocation8 + $0x8] sm:$0xff] }
  0xf5   :  { %705 = vmatpush.bf16.msra.mxu2 %v2233_v3 }
  0xf8   :  { %v2266_v60 = vpop.eup %2265 }
  0xf9   :  { %v555_v61 = vmul.f32 %v2266_v60, %v553_v59  ;;  %vm560_vm1 = vweird.f32 %v2266_v60 }
  0xfa   :  { %vm561_vm3 = vmor %vm559_vm2, %vm560_vm1 }
  0xfb   :  { %v556_v62 = vsub.f32 1.0, %v555_v61 }
  0xfd   :  { %v557_v63 = vmul.f32 %v2266_v60, %v556_v62 }
  0xff   :  { %v558_v1 = vadd.f32 %v2266_v60, %v557_v63 }
 0x101   :  { %v562_v4 = vsel %vm561_vm3, %v2266_v60, %v558_v1 }
 0x102   :  { %v567_v12 = vsel %vm564_vm4, %v566_v10, %v562_v4  ;;  %v2232_v4 = vld [vmem:[#allocation8] sm:$0xff] }
 0x103   :  { %v570_v14 = vmul.f32 0.0, %v567_v12  ;;  %706 = vmatpush.bf16.msra.mxu2 %v2232_v4 }
 0x160   :  { %v573_v11 = vpop.permute.xlu0 %572 }
 0x161   :  { %v575_v13 = vmul.f32 %v573_v11, %v567_v12 }
 0x163   :  { %577 = vrot.lane.b32.xlu0 %v575_v13, %s2525_s3 }
 0x1d5   :  { %v578_v15 = vpop.permute.xlu0 %577 }
 0x1d6   :  { %v580_v16 = vadd.f32 %v578_v15, %v570_v14  ;;  %v434_v14 = vpop.f32.mrf.mxu0 }
 0x1d7   :  { %v435_v15 = vadd.f32 %v434_v14, %v2638_v17 }
 0x1d8   :  { %2267 = vtanh.f32 %v580_v16 }
 0x1de   :  { %v2268_v22 = vpop.eup %2267 }
 0x1df   :  { %583 = vrot.lane.b32.xlu1 %v2268_v22, %s2525_s3 }
 0x251   :  { %v584_v25 = vpop.permute.xlu1 %583 }
 0x252   :  { %v2672_v26 = vmul.f32 %v584_v25, %v567_v12 }
 0x254   :  { %v594_v27 = vpack.c.bf16 %v2672_v26, %v2672_v26 }
 0x256   :  { %600 = vrot.lane.b32.xlu1 %v594_v27, %s2521_s25 }
 0x2c8   :  { %v601_v28 = vpop.permute.xlu1 %600 }
 0x2c9   :  { %2143 = vmatmul.msk.bf16.vlgmr.msrb.gmra.mxu3 %vm532_vm5, %v601_v28 }
 0x34c   :  { %v626_v47 = vpop.f32.mrf.mxu3 }
 0x34d   :  { %v630_v48 = vadd.f32 %v626_v47, %v481_v42 }
 0x34f   :  { %2269 = vtanh.f32 %v630_v48  ;;  %v2144_v5 = vmul.f32 -1.442695, %v630_v48 }
 0x351   :  { %2271 = vpow2.f32 %v2144_v5 }
 0x354   :  { %v628_v49 = vpop.f32.mrf.mxu3 }
 0x355   :  { %v2270_v50 = vpop.eup %2269 }
 0x356   :  { %653 = vrot.lane.b32.xlu2 %v2270_v50, %s2525_s3 }
 0x357   :  { %v2272_v7 = vpop.eup %2271 }
 0x358   :  { %v634_v51 = vadd.f32 1.0, %v2272_v7 }
 0x35a   :  { %2273 = vrcp.f32 %v634_v51  ;;  %v646_v55 = vand.u32 2147483648, %v634_v51  ;;  %vm640_vm7 = vweird.f32 %v634_v51  ;;  %v644_v56 = vand.u32 2147483647, %v634_v51 }
 0x35c   :  { %v647_v58 = vor.u32 1.1754944e-38, %v646_v55  ;;  %vm645_vm9 = vcmp.eq.f32.partialorder %v644_v56, 8.507059e+37 }
 0x360   :  { %v2274_v6 = vpop.eup %2273 }
 0x361   :  { %v636_v52 = vmul.f32 %v2274_v6, %v634_v51  ;;  %vm641_vm6 = vweird.f32 %v2274_v6 }
 0x362   :  { %vm642_vm8 = vmor %vm640_vm7, %vm641_vm6 }
 0x363   :  { %v637_v53 = vsub.f32 1.0, %v636_v52 }
 0x365   :  { %v638_v54 = vmul.f32 %v2274_v6, %v637_v53  ;;  %v2235_v53 = vld [vmem:[#allocation8 + $0x8] sm:$0xff] }
 0x366   :  { %787 = vmatpush.bf16.msra.mxu3 %v2235_v53 }
 0x367   :  { %v639_v8 = vadd.f32 %v2274_v6, %v638_v54  ;;  %v2234_v54 = vld [vmem:[#allocation8] sm:$0xff] }
 0x369   :  { %v643_v57 = vsel %vm642_vm8, %v2274_v6, %v639_v8 }
 0x36a   :  { %v648_v60 = vsel %vm645_vm9, %v647_v58, %v643_v57  ;;  %788 = vmatpush.bf16.msra.mxu3 %v2234_v54  ;;  %v192_v58 = vadd.f32 %v2635_v9, %v2640_v18 }
 0x36b   :  { %v651_v62 = vmul.f32 %v648_v60, %v580_v16  ;;  %v484_v16 = vpop.f32.mrf.mxu1 }
 0x36c   :  { %v485_v22 = vadd.f32 %v484_v16, %v435_v15 }
 0x3b0   :  { %v654_v59 = vpop.permute.xlu2 %653 }
 0x3b1   :  { %v656_v61 = vmul.f32 %v654_v59, %v648_v60  ;;  %v262_v59 = vadd.f32 %v2644_v20, %v192_v58 }
 0x3b3   :  { %658 = vrot.lane.b32.xlu2 %v656_v61, %s2525_s3  ;;  %v438_v61 = vpop.f32.mrf.mxu0 }
 0x40d   :  { %v659_v63 = vpop.permute.xlu2 %658 }
 0x40e   :  { %v661_v1 = vadd.f32 %v659_v63, %v651_v62 }
 0x410   :  { %2275 = vtanh.f32 %v661_v1 }
 0x416   :  { %v2276_v2 = vpop.eup %2275 }
 0x417   :  { %664 = vrot.lane.b32.xlu0 %v2276_v2, %s2525_s3 }
 0x489   :  { %v665_v10 = vpop.permute.xlu0 %664 }
 0x48a   :  { %v2688_v11 = vmul.f32 %v665_v10, %v648_v60  ;;  %v317_v60 = vadd.f32 %v2642_v19, %v262_v59 }
 0x48c   :  { %v676_v12 = vpack.c.bf16 %v2688_v11, %v2688_v11  ;;  %v379_v62 = vadd.f32 %v2646_v21, %v317_v60 }
 0x48e   :  { %682 = vrot.lane.b32.xlu1 %v676_v12, %s2521_s25  ;;  %v439_v63 = vadd.f32 %v438_v61, %v379_v62 }
 0x500   :  { %v683_v13 = vpop.permute.xlu1 %682 }
 0x501   :  { %2153 = vmatmul.msk.bf16.vlgmr.msra.gmra.mxu2 %vm532_vm5, %v683_v13 }
 0x584   :  { %v708_v23 = vpop.f32.mrf.mxu2 }
 0x585   :  { %v712_v24 = vadd.f32 %v708_v23, %v485_v22 }
 0x587   :  { %2277 = vtanh.f32 %v712_v24  ;;  %v2154_v28 = vmul.f32 -1.442695, %v712_v24 }
 0x589   :  { %2279 = vpow2.f32 %v2154_v28 }
 0x58c   :  { %v710_v25 = vpop.f32.mrf.mxu2 }
 0x58d   :  { %v2278_v27 = vpop.eup %2277 }
 0x58e   :  { %735 = vrot.lane.b32.xlu2 %v2278_v27, %s2525_s3 }
 0x58f   :  { %v2280_v34 = vpop.eup %2279 }
 0x590   :  { %v716_v35 = vadd.f32 1.0, %v2280_v34 }
 0x592   :  { %2281 = vrcp.f32 %v716_v35  ;;  %v728_v17 = vand.u32 2147483648, %v716_v35  ;;  %vm722_vm11 = vweird.f32 %v716_v35  ;;  %v726_v42 = vand.u32 2147483647, %v716_v35 }
 0x594   :  { %v729_v48 = vor.u32 1.1754944e-38, %v728_v17  ;;  %vm727_vm13 = vcmp.eq.f32.partialorder %v726_v42, 8.507059e+37 }
 0x598   :  { %v2282_v36 = vpop.eup %2281 }
 0x599   :  { %v718_v38 = vmul.f32 %v2282_v36, %v716_v35  ;;  %vm723_vm10 = vweird.f32 %v2282_v36 }
 0x59a   :  { %vm724_vm12 = vmor %vm722_vm11, %vm723_vm10 }
 0x59b   :  { %v719_v39 = vsub.f32 1.0, %v718_v38 }
 0x59d   :  { %v720_v40 = vmul.f32 %v2282_v36, %v719_v39 }
 0x59f   :  { %v721_v41 = vadd.f32 %v2282_v36, %v720_v40  ;;  %v2237_v40 = vld [vmem:[#allocation8 + $0x8] sm:$0xff] }
 0x5a0   :  { %869 = vmatpush.bf16.msrb.mxu2 %v2237_v40 }
 0x5a1   :  { %v725_v47 = vsel %vm724_vm12, %v2282_v36, %v721_v41  ;;  %v2236_v41 = vld [vmem:[#allocation8] sm:$0xff] }
 0x5a2   :  { %v730_v50 = vsel %vm727_vm13, %v729_v48, %v725_v47 }
 0x5a3   :  { %v733_v7 = vmul.f32 %v730_v50, %v661_v1  ;;  %v488_v1 = vpop.f32.mrf.mxu1 }
 0x5a4   :  { %v489_v2 = vadd.f32 %v488_v1, %v439_v63  ;;  %870 = vmatpush.bf16.msrb.mxu2 %v2236_v41 }
 0x5e8   :  { %v736_v49 = vpop.permute.xlu2 %735 }
 0x5e9   :  { %v738_v5 = vmul.f32 %v736_v49, %v730_v50  ;;  %v442_v49 = vpop.f32.mrf.mxu0 }
 0x5eb   :  { %740 = vrot.lane.b32.xlu0 %v738_v5, %s2525_s3  ;;  %v492_v5 = vpop.f32.mrf.mxu1 }
 0x65d   :  { %v741_v51 = vpop.permute.xlu0 %740 }
 0x65e   :  { %v743_v6 = vadd.f32 %v741_v51, %v733_v7 }
 0x660   :  { %2283 = vtanh.f32 %v743_v6 }
 0x666   :  { %v2284_v52 = vpop.eup %2283 }
 0x667   :  { %746 = vrot.lane.b32.xlu1 %v2284_v52, %s2525_s3 }
 0x6d9   :  { %v747_v8 = vpop.permute.xlu1 %746 }
 0x6da   :  { %v2698_v55 = vmul.f32 %v747_v8, %v730_v50  ;;  %v443_v50 = vadd.f32 %v442_v49, %v2649_v29 }
 0x6dc   :  { %v758_v56 = vpack.c.bf16 %v2698_v55, %v2698_v55  ;;  %v493_v7 = vadd.f32 %v492_v5, %v443_v50 }
 0x6de   :  { %764 = vrot.lane.b32.xlu2 %v758_v56, %s2521_s25 }
 0x738   :  { %v765_v57 = vpop.permute.xlu2 %764 }
 0x739   :  { %2163 = vmatmul.msk.bf16.vlgmr.msra.gmra.mxu3 %vm532_vm5, %v765_v57 }
 0x7bc   :  { %v790_v3 = vpop.f32.mrf.mxu3 }
 0x7bd   :  { %v794_v4 = vadd.f32 %v790_v3, %v489_v2 }
 0x7bf   :  { %2285 = vtanh.f32 %v794_v4  ;;  %v2164_v13 = vmul.f32 -1.442695, %v794_v4 }
 0x7c1   :  { %2287 = vpow2.f32 %v2164_v13 }
 0x7c4   :  { %v792_v10 = vpop.f32.mrf.mxu3 }
 0x7c5   :  { %v2286_v12 = vpop.eup %2285 }
 0x7c6   :  { %817 = vrot.lane.b32.xlu0 %v2286_v12, %s2525_s3 }
 0x7c7   :  { %v2288_v18 = vpop.eup %2287 }
 0x7c8   :  { %v798_v14 = vadd.f32 1.0, %v2288_v18 }
 0x7ca   :  { %2289 = vrcp.f32 %v798_v14  ;;  %v810_v22 = vand.u32 2147483648, %v798_v14  ;;  %vm804_vm15 = vweird.f32 %v798_v14  ;;  %v808_v23 = vand.u32 2147483647, %v798_v14 }
 0x7cc   :  { %v811_v25 = vor.u32 1.1754944e-38, %v810_v22  ;;  %vm809_vm1 = vcmp.eq.f32.partialorder %v808_v23, 8.507059e+37  ;;  %v208_v22 = vadd.f32 %v2635_v9, %v2651_v30 }
 0x7ce   :  { %v270_v23 = vadd.f32 %v2655_v32, %v208_v22 }
 0x7d0   :  { %v2290_v20 = vpop.eup %2289 }
 0x7d1   :  { %v800_v19 = vmul.f32 %v2290_v20, %v798_v14  ;;  %vm805_vm14 = vweird.f32 %v2290_v20  ;;  %v2239_v14 = vld [vmem:[#allocation8 + $0x8] sm:$0xff] }
 0x7d2   :  { %vm806_vm0 = vmor %vm804_vm15, %vm805_vm14  ;;  %951 = vmatpush.bf16.msrb.mxu3 %v2239_v14 }
 0x7d3   :  { %v801_v15 = vsub.f32 1.0, %v800_v19 }
 0x7d5   :  { %v802_v16 = vmul.f32 %v2290_v20, %v801_v15 }
 0x7d7   :  { %v803_v21 = vadd.f32 %v2290_v20, %v802_v16 }
 0x7d9   :  { %v807_v24 = vsel %vm806_vm0, %v2290_v20, %v803_v21  ;;  %v2238_v20 = vld [vmem:[#allocation8] sm:$0xff] }
 0x7da   :  { %v812_v28 = vsel %vm809_vm1, %v811_v25, %v807_v24  ;;  %952 = vmatpush.bf16.msrb.mxu3 %v2238_v20  ;;  %v327_v24 = vadd.f32 %v2653_v31, %v270_v23  ;;  %v446_v25 = vpop.f32.mrf.mxu0 }
 0x7db   :  { %v815_v35 = vmul.f32 %v812_v28, %v743_v6 }
 0x838   :  { %v818_v27 = vpop.permute.xlu0 %817 }
 0x839   :  { %v820_v34 = vmul.f32 %v818_v27, %v812_v28  ;;  %v391_v27 = vadd.f32 %v2657_v33, %v327_v24 }
 0x83b   :  { %822 = vrot.lane.b32.xlu1 %v820_v34, %s2525_s3  ;;  %v496_v34 = vpop.f32.mrf.mxu1 }
 0x8ad   :  { %v823_v36 = vpop.permute.xlu1 %822 }
 0x8ae   :  { %v825_v38 = vadd.f32 %v823_v36, %v815_v35 }
 0x8b0   :  { %2291 = vtanh.f32 %v825_v38 }
 0x8b6   :  { %v2292_v39 = vpop.eup %2291 }
 0x8b7   :  { %828 = vrot.lane.b32.xlu2 %v2292_v39, %s2525_s3 }
 0x911   :  { %v829_v17 = vpop.permute.xlu2 %828 }
 0x912   :  { %v2712_v42 = vmul.f32 %v829_v17, %v812_v28  ;;  %v447_v28 = vadd.f32 %v446_v25, %v391_v27 }
 0x914   :  { %v840_v47 = vpack.c.bf16 %v2712_v42, %v2712_v42  ;;  %v497_v35 = vadd.f32 %v496_v34, %v447_v28 }
 0x916   :  { %846 = vrot.lane.b32.xlu0 %v840_v47, %s2521_s25 }
 0x988   :  { %v847_v48 = vpop.permute.xlu0 %846 }
 0x989   :  { %2173 = vmatmul.msk.bf16.vlgmr.msrb.gmra.mxu2 %vm532_vm5, %v847_v48 }
 0xa0c   :  { %v872_v51 = vpop.f32.mrf.mxu2 }
 0xa0d   :  { %v876_v6 = vadd.f32 %v872_v51, %v493_v7 }
 0xa0f   :  { %2293 = vtanh.f32 %v876_v6  ;;  %v2174_v54 = vmul.f32 -1.442695, %v876_v6 }
 0xa11   :  { %2295 = vpow2.f32 %v2174_v54 }
 0xa14   :  { %v874_v52 = vpop.f32.mrf.mxu2 }
 0xa15   :  { %v2294_v53 = vpop.eup %2293 }
 0xa16   :  { %899 = vrot.lane.b32.xlu1 %v2294_v53, %s2525_s3 }
 0xa17   :  { %v2296_v8 = vpop.eup %2295 }
 0xa18   :  { %v880_v56 = vadd.f32 1.0, %v2296_v8 }
 0xa1a   :  { %2297 = vrcp.f32 %v880_v56  ;;  %v892_v29 = vand.u32 2147483648, %v880_v56  ;;  %vm886_vm3 = vweird.f32 %v880_v56  ;;  %v890_v62 = vand.u32 2147483647, %v880_v56 }
 0xa1c   :  { %v893_v1 = vor.u32 1.1754944e-38, %v892_v29  ;;  %vm891_vm6 = vcmp.eq.f32.partialorder %v890_v62, 8.507059e+37  ;;  %v450_v62 = vpop.f32.mrf.mxu0 }
 0xa20   :  { %v2298_v57 = vpop.eup %2297 }
 0xa21   :  { %v882_v58 = vmul.f32 %v2298_v57, %v880_v56  ;;  %vm887_vm2 = vweird.f32 %v2298_v57 }
 0xa22   :  { %vm888_vm4 = vmor %vm886_vm3, %vm887_vm2 }
 0xa23   :  { %v883_v59 = vsub.f32 1.0, %v882_v58  ;;  %v2240_v58 = vld [vmem:[#allocation8] sm:$0xff] }
 0xa25   :  { %v884_v60 = vmul.f32 %v2298_v57, %v883_v59 }
 0xa27   :  { %v885_v61 = vadd.f32 %v2298_v57, %v884_v60 }
 0xa29   :  { %v889_v63 = vsel %vm888_vm4, %v2298_v57, %v885_v61  ;;  %v2241_v57 = vld [vmem:[#allocation8 + $0x8] sm:$0xff] }
 0xa2a   :  { %v894_v3 = vsel %vm891_vm6, %v893_v1, %v889_v63  ;;  %1033 = vmatpush.bf16.msra.mxu2 %v2241_v57  ;;  %v451_v63 = vadd.f32 %v450_v62, %v2661_v43  ;;  %v500_v1 = vpop.f32.mrf.mxu1 }
 0xa2b   :  { %v897_v10 = vmul.f32 %v894_v3, %v825_v38 }
 0xa2e   :  { %1034 = vmatpush.bf16.msra.mxu2 %v2240_v58 }
 0xa88   :  { %v900_v2 = vpop.permute.xlu1 %899 }
 0xa89   :  { %v902_v4 = vmul.f32 %v900_v2, %v894_v3  ;;  %v501_v2 = vadd.f32 %v500_v1, %v451_v63 }
 0xa8b   :  { %904 = vrot.lane.b32.xlu2 %v902_v4, %s2525_s3 }
 0xae5   :  { %v905_v12 = vpop.permute.xlu2 %904 }
 0xae6   :  { %v907_v13 = vadd.f32 %v905_v12, %v897_v10 }
 0xae8   :  { %2299 = vtanh.f32 %v907_v13 }
 0xaee   :  { %v2300_v18 = vpop.eup %2299 }
 0xaef   :  { %910 = vrot.lane.b32.xlu0 %v2300_v18, %s2525_s3 }
 0xb61   :  { %v911_v19 = vpop.permute.xlu0 %910 }
 0xb62   :  { %v2722_v15 = vmul.f32 %v911_v19, %v894_v3 }
 0xb64   :  { %v922_v16 = vpack.c.bf16 %v2722_v15, %v2722_v15 }
 0xb66   :  { %928 = vrot.lane.b32.xlu1 %v922_v16, %s2521_s25 }
 0xbd8   :  { %v929_v21 = vpop.permute.xlu1 %928 }
 0xbd9   :  { %2183 = vmatmul.msk.bf16.vlgmr.msrb.gmra.mxu3 %vm532_vm5, %v929_v21 }
 0xc5c   :  { %v954_v36 = vpop.f32.mrf.mxu3 }
 0xc5d   :  { %v958_v38 = vadd.f32 %v954_v36, %v497_v35 }
 0xc5f   :  { %2301 = vtanh.f32 %v958_v38  ;;  %v2184_v41 = vmul.f32 -1.442695, %v958_v38 }
 0xc61   :  { %2303 = vpow2.f32 %v2184_v41  ;;  %v2242_v41 = vld [vmem:[#allocation8] sm:$0xff] }
 0xc64   :  { %v956_v39 = vpop.f32.mrf.mxu3 }
 0xc65   :  { %v2302_v40 = vpop.eup %2301 }
 0xc66   :  { %981 = vrot.lane.b32.xlu2 %v2302_v40, %s2525_s3  ;;  %v2243_v40 = vld [vmem:[#allocation8 + $0x8] sm:$0xff] }
 0xc67   :  { %v2304_v30 = vpop.eup %2303  ;;  %1115 = vmatpush.bf16.msra.mxu3 %v2243_v40 }
 0xc68   :  { %v962_v17 = vadd.f32 1.0, %v2304_v30 }
 0xc6a   :  { %2305 = vrcp.f32 %v962_v17  ;;  %v974_v49 = vand.u32 2147483648, %v962_v17  ;;  %vm968_vm8 = vweird.f32 %v962_v17  ;;  %v972_v50 = vand.u32 2147483647, %v962_v17 }
 0xc6b   :  { %1116 = vmatpush.bf16.msra.mxu3 %v2242_v41 }
 0xc6c   :  { %v975_v7 = vor.u32 1.1754944e-38, %v974_v49  ;;  %vm973_vm10 = vcmp.eq.f32.partialorder %v972_v50, 8.507059e+37  ;;  %v1175_v50 = vld [vmem:[#allocation9 + $0x8] sm:$0xff] }
 0xc70   :  { %v2306_v32 = vpop.eup %2305 }
 0xc71   :  { %v964_v31 = vmul.f32 %v2306_v32, %v962_v17  ;;  %vm969_vm7 = vweird.f32 %v2306_v32 }
 0xc72   :  { %vm970_vm9 = vmor %vm968_vm8, %vm969_vm7 }
 0xc73   :  { %v965_v47 = vsub.f32 1.0, %v964_v31  ;;  %v1177_v31 = vld [vmem:[#allocation9 + $0x18] sm:$0xff] }
 0xc75   :  { %v966_v48 = vmul.f32 %v2306_v32, %v965_v47  ;;  %v1218_v47 = vand.u32 4294901760, %v1177_v31 }
 0xc77   :  { %v967_v33 = vadd.f32 %v2306_v32, %v966_v48  ;;  %v1176_v48 = vld [vmem:[#allocation9 + $0x10] sm:$0xff]  ;;  %1438 = vmatpush.msrb.mxu3 %v1218_v47  ;;  %1219 = vmatpush.msra.mxu0 %v1218_v47 }
 0xc78   :  { %v1220_v49 = vand.u32 4294901760, %v1176_v48 }
 0xc79   :  { %v971_v5 = vsel %vm970_vm9, %v2306_v32, %v967_v33  ;;  %v1304_v33 = vsub.f32 %v1177_v31, %v1218_v47 }
 0xc7a   :  { %v976_v6 = vsel %vm973_vm10, %v975_v7, %v971_v5  ;;  %v1310_v7 = vsub.f32 %v1176_v48, %v1220_v49  ;;  %1440 = vmatpush.msrb.mxu3 %v1220_v49  ;;  %1221 = vmatpush.msra.mxu0 %v1220_v49 }
 0xc7b   :  { %v979_v53 = vmul.f32 %v976_v6, %v907_v13  ;;  %v1305_v5 = vand.u32 4294901760, %v1304_v33  ;;  %1374 = vmatpush.msrb.mxu2 %v1304_v33 }
 0xc7d   :  { %1377 = vmatpush.msrb.mxu2 %v1310_v7 }
 0xcc0   :  { %v982_v51 = vpop.permute.xlu2 %981 }
 0xcc1   :  { %v984_v52 = vmul.f32 %v982_v51, %v976_v6  ;;  %v1222_v51 = vand.u32 4294901760, %v1175_v50 }
 0xcc3   :  { %986 = vrot.lane.b32.xlu0 %v984_v52, %s2525_s3  ;;  %v1311_v52 = vand.u32 4294901760, %v1310_v7  ;;  %1442 = vmatpush.msrb.mxu3 %v1222_v51 }
 0xcc4   :  { %1223 = vmatpush.msra.mxu0 %v1222_v51 }
 0xd35   :  { %v987_v54 = vpop.permute.xlu0 %986 }
 0xd36   :  { %v989_v8 = vadd.f32 %v987_v54, %v979_v53 }
 0xd38   :  { %2307 = vtanh.f32 %v989_v8 }
 0xd3e   :  { %v2308_v56 = vpop.eup %2307 }
 0xd3f   :  { %992 = vrot.lane.b32.xlu1 %v2308_v56, %s2525_s3 }
 0xdb1   :  { %v993_v59 = vpop.permute.xlu1 %992 }
 0xdb2   :  { %v995_v60 = vmul.f32 %v993_v59, %v976_v6  ;;  %v1174_v6 = vld [vmem:[#allocation9] sm:$0xff] }
 0xdb3   :  { %v1224_v53 = vand.u32 4294901760, %v1174_v6 }
 0xdb4   :  { %v1004_v61 = vpack.c.bf16 %v995_v60, %v995_v60 }
 0xdb5   :  { %v1322_v57 = vsub.f32 %v1174_v6, %v1224_v53  ;;  %1444 = vmatpush.msrb.mxu3 %v1224_v53  ;;  %1225 = vmatpush.msra.mxu0 %v1224_v53 }
 0xdb6   :  { %1010 = vrot.lane.b32.xlu2 %v1004_v61, %s2521_s25 }
 0xdb7   :  { %1509 = vmatpush.msrb.mxu0 %v1305_v5 }
 0xdb9   :  { %1513 = vmatpush.msrb.mxu0 %v1311_v52 }
 0xe10   :  { %v1011_v29 = vpop.permute.xlu2 %1010 }
 0xe11   :  { %2193 = vmatmul.msk.bf16.vlgmr.msra.gmra.mxu2 %vm532_vm5, %v1011_v29 }
 0xe94   :  { %v1036_v3 = vpop.f32.mrf.mxu2 }
 0xe95   :  { %v1040_v4 = vadd.f32 %v1036_v3, %v501_v2 }
 0xe97   :  { %2309 = vtanh.f32 %v1040_v4  ;;  %v2194_v13 = vmul.f32 -1.442695, %v1040_v4 }
 0xe99   :  { %2311 = vpow2.f32 %v2194_v13 }
 0xe9c   :  { %v1038_v10 = vpop.f32.mrf.mxu2 }
 0xe9d   :  { %v2310_v12 = vpop.eup %2309 }
 0xe9e   :  { %1063 = vrot.lane.b32.xlu0 %v2310_v12, %s2525_s3 }
 0xe9f   :  { %v2312_v18 = vpop.eup %2311 }
 0xea0   :  { %v1044_v14 = vadd.f32 1.0, %v2312_v18 }
 0xea2   :  { %2313 = vrcp.f32 %v1044_v14  ;;  %v1056_v43 = vand.u32 2147483648, %v1044_v14  ;;  %vm1050_vm12 = vweird.f32 %v1044_v14  ;;  %v1054_v23 = vand.u32 2147483647, %v1044_v14 }
 0xea4   :  { %v1057_v25 = vor.u32 1.1754944e-38, %v1056_v43  ;;  %vm1055_vm14 = vcmp.eq.f32.partialorder %v1054_v23, 8.507059e+37 }
 0xea8   :  { %v2314_v20 = vpop.eup %2313 }
 0xea9   :  { %v1046_v19 = vmul.f32 %v2314_v20, %v1044_v14  ;;  %vm1051_vm11 = vweird.f32 %v2314_v20 }
 0xeaa   :  { %vm1052_vm13 = vmor %vm1050_vm12, %vm1051_vm11 }
 0xeab   :  { %v1047_v16 = vsub.f32 1.0, %v1046_v19  ;;  %v224_v19 = vadd.f32 %v2635_v9, %v2663_v44 }
 0xead   :  { %v1048_v21 = vmul.f32 %v2314_v20, %v1047_v16  ;;  %v278_v16 = vadd.f32 %v2667_v46, %v224_v19 }
 0xeaf   :  { %v1049_v22 = vadd.f32 %v2314_v20, %v1048_v21  ;;  %v337_v21 = vadd.f32 %v2665_v45, %v278_v16 }
 0xeb1   :  { %v1053_v24 = vsel %vm1052_vm13, %v2314_v20, %v1049_v22  ;;  %v454_v22 = vpop.f32.mrf.mxu0  ;;  %v403_v43 = vadd.f32 %v2682_v37, %v337_v21 }
 0xeb2   :  { %v1058_v28 = vsel %vm1055_vm14, %v1057_v25, %v1053_v24  ;;  %v504_v24 = vpop.f32.mrf.mxu1 }
 0xeb3   :  { %v1061_v35 = vmul.f32 %v1058_v28, %v989_v8  ;;  %v1312_v8 = vsub.f32 %v1310_v7, %v1311_v52  ;;  %v455_v23 = vadd.f32 %v454_v22, %v403_v43 }
 0xeb5   :  { %v1313_v58 = vand.u32 4294901760, %v1312_v8  ;;  %v505_v25 = vadd.f32 %v504_v24, %v455_v23 }
 0xf10   :  { %v1064_v27 = vpop.permute.xlu0 %1063 }
 0xf11   :  { %v1066_v34 = vmul.f32 %v1064_v27, %v1058_v28 }
 0xf13   :  { %1068 = vrot.lane.b32.xlu1 %v1066_v34, %s2525_s3 }
 0xf85   :  { %v1069_v36 = vpop.permute.xlu1 %1068 }
 0xf86   :  { %v2741_v38 = vadd.f32 %v1069_v36, %v1061_v35 }
 0xf88   :  { %2315 = vtanh.f32 %v2741_v38 }
 0xf8e   :  { %v2316_v39 = vpop.eup %2315 }
 0xf8f   :  { %1074 = vrot.lane.b32.xlu2 %v2316_v39, %s2525_s3 }
 0xfe9   :  { %v1075_v30 = vpop.permute.xlu2 %1074 }
 0xfea   :  { %v2745_v17 = vmul.f32 %v1075_v30, %v1058_v28 }
 0xfec   :  { %v1086_v32 = vpack.c.bf16 %v2745_v17, %v2745_v17 }
 0xfee   :  { %1092 = vrot.lane.b32.xlu0 %v1086_v32, %s2521_s25 }
 0xff6   :  { %588 = vrot.lane.b32.xlu0 %v2672_v26, %s2521_s25  ;;  %v1306_v26 = vsub.f32 %v1304_v33, %v1305_v5 }
 0xff8   :  { %v1307_v54 = vand.u32 4294901760, %v1306_v26 }
 0xffa   :  { %1308 = vmatpush.msra.mxu1 %v1307_v54 }
 0xffc   :  { %1314 = vmatpush.msra.mxu1 %v1313_v58 }
 0xffe   :  { %751 = vrot.lane.b32.xlu0 %v2698_v55, %s2521_s25  ;;  %v1316_v55 = vsub.f32 %v1175_v50, %v1222_v51 }
0x1000   :  { %v1317_v56 = vand.u32 4294901760, %v1316_v55  ;;  %1380 = vmatpush.msrb.mxu2 %v1316_v55 }
0x1002   :  { %v1318_v59 = vsub.f32 %v1316_v55, %v1317_v56  ;;  %1383 = vmatpush.msrb.mxu2 %v1322_v57  ;;  %1517 = vmatpush.msrb.mxu0 %v1317_v56 }
0x1004   :  { %v1319_v61 = vand.u32 4294901760, %v1318_v59 }
0x1006   :  { %997 = vrot.lane.b32.xlu0 %v995_v60, %s2521_s25  ;;  %v1323_v60 = vand.u32 4294901760, %v1322_v57  ;;  %1320 = vmatpush.msra.mxu1 %v1319_v61 }
0x1008   :  { %v1324_v29 = vsub.f32 %v1322_v57, %v1323_v60  ;;  %1521 = vmatpush.msrb.mxu0 %v1323_v60 }
0x100a   :  { %v1325_v62 = vand.u32 4294901760, %v1324_v29 }
0x100c   :  { %1326 = vmatpush.msra.mxu1 %v1325_v62 }
0x100e   :  { %1568 = vmatpush.msrb.mxu1 %v1218_v47 }
0x1010   :  { %1570 = vmatpush.msrb.mxu1 %v1220_v49 }
0x1012   :  { %1572 = vmatpush.msrb.mxu1 %v1222_v51 }
0x1014   :  { %1574 = vmatpush.msrb.mxu1 %v1224_v53 }
0x1060   :  { %v1093_v63 = vpop.permute.xlu0 %1092 }
0x1061   :  { %2203 = vmatmul.msk.bf16.vlgmr.msra.gmra.mxu3 %vm532_vm5, %v1093_v63 }
0x1068   :  { %v589_v1 = vpop.permute.xlu0 %588 }
0x1069   :  { %591 = vst.msk [vmem:[#allocation2] sm:$0xff] %vm532_vm5, %v589_v1 }
0x1070   :  { %v752_v2 = vpop.permute.xlu0 %751  ;;  %v1166_v3 = vld [vmem:[#allocation2] sm:$0xff] }
0x1071   :  { %755 = vst.msk [vmem:[#allocation2 + $0x10] sm:$0xff] %vm532_vm5, %v752_v2  ;;  %v1183_v4 = vsel %vm532_vm5, %v1166_v3, 0 }
0x1072   :  { %v2759_v10 = vand.u32 4294901760, %v1183_v4 }
0x1074   :  { %1328 = vmatmul.f32.vlgmr.msra.gmra.mxu1 %v2759_v10  ;;  %v1227_v12 = vsub.f32 %v1183_v4, %v2759_v10 }
0x1076   :  { %1386 = vmatmul.f32.vlgmr.msrb.gmra.mxu2 %v1227_v12  ;;  %v1228_v13 = vand.u32 4294901760, %v1227_v12 }
0x1078   :  { %1448 = vmatmul.f32.vlgmr.msrb.gmra.mxu3 %v1228_v13  ;;  %v998_v18 = vpop.permute.xlu0 %997  ;;  %v1229_v14 = vsub.f32 %v1227_v12, %v1228_v13  ;;  %v1168_v48 = vld [vmem:[#allocation2 + $0x10] sm:$0xff] }
0x1079   :  { %1001 = vst.msk [vmem:[#allocation2 + $0x28] sm:$0xff] %vm532_vm5, %v998_v18  ;;  %v1189_v33 = vsel %vm532_vm5, %v1168_v48, 0 }
0x107a   :  { %v1230_v20 = vand.u32 4294901760, %v1229_v14  ;;  %v2786_v51 = vand.u32 4294901760, %v1189_v33 }
0x107c   :  { %1231 = vmatmul.f32.vlgmr.msra.gmra.mxu0 %v1230_v20  ;;  %v1243_v52 = vsub.f32 %v1189_v33, %v2786_v51 }
0x107e   :  { %v1244_v57 = vand.u32 4294901760, %v1243_v52 }
0x1080   :  { %v1245_v59 = vsub.f32 %v1243_v52, %v1244_v57 }
0x1082   :  { %v1246_v61 = vand.u32 4294901760, %v1245_v59 }
0x10e4   :  { %v1118_v27 = vpop.f32.mrf.mxu3 }
0x10e5   :  { %v1122_v28 = vadd.f32 %v1118_v27, %v505_v25 }
0x10e7   :  { %2317 = vtanh.f32 %v1122_v28  ;;  %v2204_v9 = vmul.f32 -1.442695, %v1122_v28 }
0x10e9   :  { %2319 = vpow2.f32 %v2204_v9 }
0x10ec   :  { %v1120_v34 = vpop.f32.mrf.mxu3 }
0x10ed   :  { %v2318_v35 = vpop.eup %2317 }
0x10ee   :  { %1145 = vrot.lane.b32.xlu1 %v2318_v35, %s2525_s3 }
0x10ef   :  { %v2320_v44 = vpop.eup %2319 }
0x10f0   :  { %v1126_v45 = vadd.f32 1.0, %v2320_v44 }
0x10f1   :  { %v2803_v12 = vpop.f32.mrf.mxu1 }
0x10f2   :  { %2321 = vrcp.f32 %v1126_v45  ;;  %v1138_v41 = vand.u32 2147483648, %v1126_v45  ;;  %vm1132_vm0 = vweird.f32 %v1126_v45 }
0x10f6   :  { %669 = vrot.lane.b32.xlu1 %v2688_v11, %s2521_s25  ;;  %v1136_v11 = vand.u32 2147483647, %v1126_v45 }
0x10f8   :  { %v2322_v46 = vpop.eup %2321  ;;  %vm1137_vm2 = vcmp.eq.f32.partialorder %v1136_v11, 8.507059e+37 }
0x10f9   :  { %v1128_v37 = vmul.f32 %v2322_v46, %v1126_v45  ;;  %vm1133_vm15 = vweird.f32 %v2322_v46  ;;  %v2805_v13 = vpop.f32.mrf.mxu0  ;;  %v2807_v18 = vpop.f32.mrf.mxu2 }
0x10fa   :  { %vm1134_vm1 = vmor %vm1132_vm0, %vm1133_vm15 }
0x10fb   :  { %v1129_v36 = vsub.f32 1.0, %v1128_v37  ;;  %v2809_v14 = vpop.f32.mrf.mxu3  ;;  %v1171_v37 = vld [vmem:[#allocation2 + $0x28] sm:$0xff] }
0x10fd   :  { %v1130_v39 = vmul.f32 %v2322_v46, %v1129_v36  ;;  %v2827_v36 = vld [vmem:[#allocation11 + $0x8] sm:$0xff] }
0x10fe   :  { %833 = vrot.lane.b32.xlu1 %v2712_v42, %s2521_s25  ;;  %v1139_v42 = vor.u32 1.1754944e-38, %v1138_v41  ;;  %1639 = vmatpush.bf16.msra.mxu2 %v2827_v36 }
0x10ff   :  { %v1131_v40 = vadd.f32 %v2322_v46, %v1130_v39  ;;  %v2830_v39 = vld [vmem:[#allocation11] sm:$0xff]  ;;  %1698 = vmatpush.bf16.msra.mxu3 %v2827_v36 }
0x1101   :  { %v1135_v30 = vsel %vm1134_vm1, %v2322_v46, %v1131_v40  ;;  %v1198_v40 = vsel %vm532_vm5, %v1171_v37, 0 }
0x1102   :  { %1640 = vmatpush.bf16.msra.mxu2 %v2830_v39 }
0x1103   :  { %1699 = vmatpush.bf16.msra.mxu3 %v2830_v39 }
0x1106   :  { %1079 = vrot.lane.b32.xlu1 %v2745_v17, %s2521_s25  ;;  %v2776_v17 = vsel %vm1137_vm2, %v1139_v42, %v1135_v30  ;;  %v2837_v42 = vand.u32 4294901760, %v1198_v40  ;;  %1757 = vmatpush.bf16.msrb.mxu2 %v2827_v36 }
0x1107   :  { %v1143_v1 = vmul.f32 %v2776_v17, %v2741_v38  ;;  %v2814_v38 = vld [vmem:[%s2972_s6] ss:$0 sm:$0xff]  ;;  %1816 = vmatpush.bf16.msrb.mxu3 %v2827_v36 }
0x110a   :  { %1758 = vmatpush.bf16.msrb.mxu2 %v2830_v39 }
0x110b   :  { %1817 = vmatpush.bf16.msrb.mxu3 %v2830_v39 }
0x1160   :  { %v1146_v32 = vpop.permute.xlu1 %1145 }
0x1161   :  { %v1148_v31 = vmul.f32 %v1146_v32, %v2776_v17 }
0x1163   :  { %1150 = vrot.lane.b32.xlu2 %v1148_v31, %s2525_s3 }
0x1168   :  { %v670_v47 = vpop.permute.xlu1 %669 }
0x1169   :  { %673 = vst.msk [vmem:[#allocation2 + $0x8] sm:$0xff] %vm532_vm5, %v670_v47  ;;  %v1267_v47 = vsub.f32 %v1198_v40, %v2837_v42 }
0x1170   :  { %v834_v49 = vpop.permute.xlu1 %833  ;;  %v1167_v50 = vld [vmem:[#allocation2 + $0x8] sm:$0xff] }
0x1171   :  { %837 = vst.msk [vmem:[#allocation2 + $0x18] sm:$0xff] %vm532_vm5, %v834_v49  ;;  %v1186_v5 = vsel %vm532_vm5, %v1167_v50, 0  ;;  %v1268_v50 = vand.u32 4294901760, %v1267_v47 }
0x1172   :  { %v2784_v7 = vand.u32 4294901760, %v1186_v5 }
0x1174   :  { %1332 = vmatmul.f32.gmra.mxu1 %v2784_v7  ;;  %v1235_v6 = vsub.f32 %v1186_v5, %v2784_v7 }
0x1176   :  { %1391 = vmatmul.f32.gmra.mxu2 %v1235_v6  ;;  %v1236_v26 = vand.u32 4294901760, %v1235_v6 }
0x1178   :  { %1454 = vmatmul.f32.gmra.mxu3 %v1236_v26  ;;  %v1080_v55 = vpop.permute.xlu1 %1079  ;;  %v1237_v53 = vsub.f32 %v1235_v6, %v1236_v26  ;;  %v1169_v54 = vld [vmem:[#allocation2 + $0x18] sm:$0xff]  ;;  %v1269_v6 = vsub.f32 %v1267_v47, %v1268_v50 }
0x1179   :  { %1083 = vst.msk [vmem:[#allocation2 + $0x30] sm:$0xff] %vm532_vm5, %v1080_v55  ;;  %v1192_v8 = vsel %vm532_vm5, %v1169_v54, 0 }
0x117a   :  { %v1238_v56 = vand.u32 4294901760, %v1237_v53  ;;  %v2793_v58 = vand.u32 4294901760, %v1192_v8 }
0x117c   :  { %1239 = vmatmul.f32.gmra.mxu0 %v1238_v56  ;;  %1336 = vmatmul.f32.gmra.mxu1 %v2786_v51  ;;  %v1251_v60 = vsub.f32 %v1192_v8, %v2793_v58 }
0x117e   :  { %1396 = vmatmul.f32.gmra.mxu2 %v1243_v52  ;;  %v1252_v29 = vand.u32 4294901760, %v1251_v60  ;;  %v1270_v52 = vand.u32 4294901760, %v1269_v6 }
0x1180   :  { %1460 = vmatmul.f32.gmra.mxu3 %v1244_v57  ;;  %v1253_v62 = vsub.f32 %v1251_v60, %v1252_v29 }
0x1182   :  { %v1254_v63 = vand.u32 4294901760, %v1253_v62 }
0x1184   :  { %1247 = vmatmul.f32.gmra.mxu0 %v1246_v61  ;;  %1340 = vmatmul.f32.gmra.mxu1 %v2793_v58 }
0x1186   :  { %1401 = vmatmul.f32.gmra.mxu2 %v1251_v60 }
0x1188   :  { %1466 = vmatmul.f32.gmra.mxu3 %v1252_v29 }
0x118c   :  { %1255 = vmatmul.f32.gmra.mxu0 %v1254_v63 }
0x11bd   :  { %v1151_v2 = vpop.permute.xlu2 %1150 }
0x11be   :  { %v1153_v3 = vadd.f32 %v1151_v2, %v1143_v1 }
0x11c0   :  { %2323 = vtanh.f32 %v1153_v3 }
0x11c6   :  { %v2324_v4 = vpop.eup %2323 }
0x11c7   :  { %1156 = vrot.lane.b32.xlu2 %v2324_v4, %s2525_s3 }
0x11cf   :  { %915 = vrot.lane.b32.xlu2 %v2722_v15, %s2521_s25 }
0x11f1   :  { %v1333_v20 = vpop.f32.mrf.mxu1 }
0x11f9   :  { %v1240_v19 = vpop.f32.mrf.mxu0  ;;  %v1392_v21 = vpop.f32.mrf.mxu2 }
0x11fa   :  { %v1241_v16 = vadd.f32 %v2814_v38, %v1240_v19  ;;  %v1337_v25 = vpop.f32.mrf.mxu1 }
0x11fb   :  { %v2817_v15 = vpop.f32.mrf.mxu3 }
0x11fc   :  { %v1334_v22 = vadd.f32 %v1333_v20, %v1241_v16 }
0x11fe   :  { %v2819_v43 = vadd.f32 %v1392_v21, %v1334_v22 }
0x1201   :  { %v1248_v23 = vpop.f32.mrf.mxu0  ;;  %v1397_v28 = vpop.f32.mrf.mxu2 }
0x1202   :  { %v1249_v24 = vadd.f32 %v2814_v38, %v1248_v23  ;;  %v2866_v63 = vpop.f32.mrf.mxu1 }
0x1203   :  { %v1461_v35 = vpop.f32.mrf.mxu3 }
0x1204   :  { %v1338_v27 = vadd.f32 %v1337_v25, %v1249_v24 }
0x1206   :  { %v1398_v34 = vadd.f32 %v1397_v28, %v1338_v27 }
0x1208   :  { %v2822_v9 = vadd.f32 %v1461_v35, %v1398_v34 }
0x1209   :  { %v2868_v1 = vpop.f32.mrf.mxu0 }
0x1221   :  { %v1157_v44 = vpop.permute.xlu2 %1156 }
0x1222   :  { %v1159_v45 = vmul.f32 %v1157_v44, %v2776_v17  ;;  %v1172_v17 = vld [vmem:[#allocation2 + $0x30] sm:$0xff] }
0x1223   :  { %v1201_v48 = vsel %vm532_vm5, %v1172_v17, 0 }
0x1224   :  { %1161 = vrot.lane.b32.xlu2 %v1159_v45, %s2521_s25  ;;  %v2849_v5 = vand.u32 4294901760, %v1201_v48 }
0x1226   :  { %v1275_v26 = vsub.f32 %v1201_v48, %v2849_v5 }
0x1228   :  { %v1276_v55 = vand.u32 4294901760, %v1275_v26 }
0x1229   :  { %v916_v46 = vpop.permute.xlu2 %915 }
0x122a   :  { %919 = vst.msk [vmem:[#allocation2 + $0x20] sm:$0xff] %vm532_vm5, %v916_v46  ;;  %v1277_v53 = vsub.f32 %v1275_v26, %v1276_v55 }
0x122c   :  { %v1278_v54 = vand.u32 4294901760, %v1277_v53 }
0x1231   :  { %v1170_v41 = vld [vmem:[#allocation2 + $0x20] sm:$0xff] }
0x1232   :  { %v1195_v11 = vsel %vm532_vm5, %v1170_v41, 0 }
0x1233   :  { %v2835_v30 = vand.u32 4294901760, %v1195_v11 }
0x1235   :  { %1344 = vmatmul.f32.gmra.mxu1 %v2835_v30  ;;  %v1259_v32 = vsub.f32 %v1195_v11, %v2835_v30  ;;  %v1233_v11 = vadd.f32 %v2814_v38, %v2805_v13 }
0x1237   :  { %1406 = vmatmul.f32.gmra.mxu2 %v1259_v32  ;;  %v1260_v31 = vand.u32 4294901760, %v1259_v32 }
0x1239   :  { %1472 = vmatmul.f32.gmra.mxu3 %v1260_v31  ;;  %v1261_v33 = vsub.f32 %v1259_v32, %v1260_v31 }
0x123b   :  { %v1262_v49 = vand.u32 4294901760, %v1261_v33 }
0x123d   :  { %1263 = vmatmul.f32.gmra.mxu0 %v1262_v49  ;;  %1348 = vmatmul.f32.gmra.mxu1 %v2837_v42 }
0x123f   :  { %1411 = vmatmul.f32.gmra.mxu2 %v1267_v47 }
0x1241   :  { %1478 = vmatmul.f32.gmra.mxu3 %v1268_v50 }
0x1245   :  { %1271 = vmatmul.f32.gmra.mxu0 %v1270_v52  ;;  %1352 = vmatmul.f32.gmra.mxu1 %v2849_v5 }
0x1247   :  { %1416 = vmatmul.f32.gmra.mxu2 %v1275_v26 }
0x1249   :  { %1484 = vmatmul.f32.gmra.mxu3 %v1276_v55 }
0x124d   :  { %1279 = vmatmul.f32.gmra.mxu0 %v1278_v54 }
0x127e   :  { %v1162_v8 = vpop.permute.xlu2 %1161 }
0x127f   :  { %1165 = vst.msk [vmem:[#allocation2 + $0x38] sm:$0xff] %vm532_vm5, %v1162_v8 }
0x1286   :  { %v1173_v56 = vld [vmem:[#allocation2 + $0x38] sm:$0xff] }
0x1287   :  { %v1204_v57 = vsel %vm532_vm5, %v1173_v56, 0 }
0x1288   :  { %v1282_v59 = vand.u32 4294901760, %v1204_v57 }
0x128a   :  { %1356 = vmatmul.f32.gmra.mxu1 %v1282_v59  ;;  %v1283_v60 = vsub.f32 %v1204_v57, %v1282_v59 }
0x128c   :  { %1421 = vmatmul.f32.gmra.mxu2 %v1283_v60  ;;  %v1284_v61 = vand.u32 4294901760, %v1283_v60 }
0x128e   :  { %1490 = vmatmul.f32.gmra.mxu3 %v1284_v61  ;;  %v1285_v29 = vsub.f32 %v1283_v60, %v1284_v61 }
0x1290   :  { %v1286_v62 = vand.u32 4294901760, %v1285_v29 }
0x1292   :  { %1287 = vmatmul.f32.gmra.mxu0 %v1286_v62  ;;  %1576 = vmatmul.f32.vlgmr.msrb.gmra.mxu1 %v2759_v10 }
0x1294   :  { %1641 = vmatmul.bf16.vlgmr.msra.gmra.mxu2 %v2524_v0  ;;  %v2872_v0 = vpop.f32.mrf.mxu2 }
0x1295   :  { %1875 = vmatpush.bf16.msra.mxu2 %v2827_v36 }
0x1299   :  { %1876 = vmatpush.bf16.msra.mxu2 %v2830_v39 }
0x129a   :  { %1523 = vmatmul.f32.vlgmr.msrb.gmra.mxu0 %v2759_v10  ;;  %1580 = vmatmul.f32.gmra.mxu1 %v2784_v7  ;;  %v2874_v10 = vpop.f32.mrf.mxu3 }
0x12a2   :  { %1527 = vmatmul.f32.gmra.mxu0 %v2784_v7  ;;  %1584 = vmatmul.f32.gmra.mxu1 %v2786_v51 }
0x12aa   :  { %1531 = vmatmul.f32.gmra.mxu0 %v2786_v51  ;;  %1588 = vmatmul.f32.gmra.mxu1 %v2793_v58 }
0x12b2   :  { %1535 = vmatmul.f32.gmra.mxu0 %v2793_v58  ;;  %1592 = vmatmul.f32.gmra.mxu1 %v2835_v30  ;;  %v1345_v2 = vpop.f32.mrf.mxu1 }
0x12ba   :  { %v1264_v7 = vpop.f32.mrf.mxu0  ;;  %1539 = vmatmul.f32.gmra.mxu0 %v2835_v30  ;;  %1596 = vmatmul.f32.gmra.mxu1 %v2837_v42  ;;  %v1407_v3 = vpop.f32.mrf.mxu2  ;;  %v1330_v30 = vadd.f32 %v2803_v12, %v1233_v11 }
0x12bb   :  { %v1265_v51 = vadd.f32 %v2814_v38, %v1264_v7  ;;  %v1349_v58 = vpop.f32.mrf.mxu1 }
0x12bc   :  { %v1473_v4 = vpop.f32.mrf.mxu3  ;;  %v1388_v47 = vadd.f32 %v2807_v18, %v1330_v30 }
0x12bd   :  { %v1346_v20 = vadd.f32 %v1345_v2, %v1265_v51 }
0x12be   :  { %v1450_v49 = vadd.f32 %v2809_v14, %v1388_v47 }
0x12bf   :  { %v1408_v19 = vadd.f32 %v1407_v3, %v1346_v20 }
0x12c1   :  { %v2879_v16 = vadd.f32 %v1473_v4, %v1408_v19 }
0x12c2   :  { %v1272_v21 = vpop.f32.mrf.mxu0  ;;  %1543 = vmatmul.f32.gmra.mxu0 %v2837_v42  ;;  %1600 = vmatmul.f32.gmra.mxu1 %v2849_v5  ;;  %v1412_v23 = vpop.f32.mrf.mxu2 }
0x12c3   :  { %v1273_v22 = vadd.f32 %v2814_v38, %v1272_v21  ;;  %v1353_v44 = vpop.f32.mrf.mxu1 }
0x12c4   :  { %v1479_v25 = vpop.f32.mrf.mxu3 }
0x12c5   :  { %v1350_v24 = vadd.f32 %v1349_v58, %v1273_v22 }
0x12c7   :  { %v1413_v27 = vadd.f32 %v1412_v23, %v1350_v24 }
0x12c9   :  { %v2884_v28 = vadd.f32 %v1479_v25, %v1413_v27  ;;  %v1456_v27 = vadd.f32 %v2817_v15, %v2819_v43 }
0x12ca   :  { %v1280_v34 = vpop.f32.mrf.mxu0  ;;  %1547 = vmatmul.f32.gmra.mxu0 %v2849_v5  ;;  %1604 = vmatmul.f32.gmra.mxu1 %v1282_v59  ;;  %v1417_v46 = vpop.f32.mrf.mxu2 }
0x12cb   :  { %v1281_v35 = vadd.f32 %v2814_v38, %v1280_v34 }
0x12cc   :  { %v1485_v40 = vpop.f32.mrf.mxu3 }
0x12cd   :  { %v1354_v45 = vadd.f32 %v1353_v44, %v1281_v35 }
0x12cf   :  { %v1418_v37 = vadd.f32 %v1417_v46, %v1354_v45 }
0x12d1   :  { %v2888_v41 = vadd.f32 %v1485_v40, %v1418_v37 }
0x12d2   :  { %1551 = vmatmul.f32.gmra.mxu0 %v1282_v59 }
0x1307   :  { %v1357_v42 = vpop.f32.mrf.mxu1 }
0x130f   :  { %v1288_v32 = vpop.f32.mrf.mxu0  ;;  %v1422_v17 = vpop.f32.mrf.mxu2 }
0x1310   :  { %v1289_v31 = vadd.f32 %v2814_v38, %v1288_v32  ;;  %v1577_v26 = vpop.f32.mrf.mxu1 }
0x1311   :  { %v2905_v24 = vpop.f32.mrf.mxu3 }
0x1312   :  { %v1358_v48 = vadd.f32 %v1357_v42, %v1289_v31 }
0x1314   :  { %v2895_v33 = vadd.f32 %v1422_v17, %v1358_v48 }
0x1317   :  { %v1524_v50 = vpop.f32.mrf.mxu0  ;;  %v1642_v5 = vpop.f32.mrf.mxu2 }
0x1318   :  { %v1525_v6 = vadd.f32 %v1524_v50, %v1450_v49  ;;  %v1581_v35 = vpop.f32.mrf.mxu1 }
0x131a   :  { %v1578_v52 = vadd.f32 %v1577_v26, %v1525_v6 }
0x131c   :  { %v1646_v13 = vadd.f32 %v1642_v5, %v1578_v52 }
0x131e   :  { %2325 = vtanh.f32 %v1646_v13  ;;  %v2213_v53 = vmul.f32 -1.442695, %v1646_v13 }
0x131f   :  { %v1644_v12 = vpop.f32.mrf.mxu2  ;;  %v1528_v25 = vpop.f32.mrf.mxu0 }
0x1320   :  { %2327 = vpow2.f32 %v2213_v53  ;;  %v1529_v34 = vadd.f32 %v1528_v25, %v1456_v27 }
0x1322   :  { %v1582_v44 = vadd.f32 %v1581_v35, %v1529_v34 }
0x1324   :  { %v2326_v55 = vpop.eup %2325 }
0x1325   :  { %1669 = vrot.lane.b32.xlu0 %v2326_v55, %s2525_s3 }
0x1326   :  { %v2328_v54 = vpop.eup %2327 }
0x1327   :  { %v1650_v18 = vadd.f32 1.0, %v2328_v54 }
0x1329   :  { %2329 = vrcp.f32 %v1650_v18  ;;  %v1662_v60 = vand.u32 2147483648, %v1650_v18  ;;  %vm1656_vm4 = vweird.f32 %v1650_v18  ;;  %v1660_v61 = vand.u32 2147483647, %v1650_v18 }
0x132b   :  { %v1663_v62 = vor.u32 1.1754944e-38, %v1662_v60  ;;  %vm1661_vm7 = vcmp.eq.f32.partialorder %v1660_v61, 8.507059e+37 }
0x132f   :  { %v2330_v8 = vpop.eup %2329 }
0x1330   :  { %v1652_v56 = vmul.f32 %v2330_v8, %v1650_v18  ;;  %vm1657_vm3 = vweird.f32 %v2330_v8 }
0x1331   :  { %vm1658_vm6 = vmor %vm1656_vm4, %vm1657_vm3 }
0x1332   :  { %v1653_v57 = vsub.f32 1.0, %v1652_v56  ;;  %v1532_v56 = vpop.f32.mrf.mxu0 }
0x1334   :  { %v1654_v14 = vmul.f32 %v2330_v8, %v1653_v57  ;;  %v1533_v57 = vadd.f32 %v1532_v56, %v2822_v9 }
0x1336   :  { %v1655_v59 = vadd.f32 %v2330_v8, %v1654_v14  ;;  %v1585_v14 = vpop.f32.mrf.mxu1 }
0x1338   :  { %v1659_v29 = vsel %vm1658_vm6, %v2330_v8, %v1655_v59  ;;  %v1586_v59 = vadd.f32 %v1585_v14, %v1533_v57 }
0x1339   :  { %v1664_v7 = vsel %vm1661_vm7, %v1663_v62, %v1659_v29 }
0x133a   :  { %v1667_v3 = vmul.f32 0.0, %v1664_v7 }
0x1397   :  { %v1670_v2 = vpop.permute.xlu0 %1669 }
0x1398   :  { %v1672_v51 = vmul.f32 %v1670_v2, %v1664_v7 }
0x139a   :  { %1674 = vrot.lane.b32.xlu1 %v1672_v51, %s2525_s3 }
0x140c   :  { %v1675_v4 = vpop.permute.xlu1 %1674 }
0x140d   :  { %v1677_v20 = vadd.f32 %v1675_v4, %v1667_v3 }
0x140f   :  { %2331 = vtanh.f32 %v1677_v20 }
0x1415   :  { %v2332_v19 = vpop.eup %2331 }
0x1416   :  { %1680 = vrot.lane.b32.xlu2 %v2332_v19, %s2525_s3 }
0x1470   :  { %v1681_v58 = vpop.permute.xlu2 %1680 }
0x1471   :  { %v1683_v21 = vmul.f32 %v1681_v58, %v1664_v7 }
0x1473   :  { %v1685_v22 = vpack.c.bf16 %v1683_v21, %v1683_v21 }
0x1475   :  { %1687 = vrot.lane.b32.xlu0 %v1685_v22, %s2521_s25 }
0x14e7   :  { %v1688_v23 = vpop.permute.xlu0 %1687 }
0x14e8   :  { %2214 = vmatmul.msk.bf16.vlgmr.msra.gmra.mxu3 %vm532_vm5, %v1688_v23 }
0x14e9   :  { %1934 = vmatpush.bf16.msra.mxu3 %v2827_v36 }
0x14ed   :  { %1935 = vmatpush.bf16.msra.mxu3 %v2830_v39 }
0x156b   :  { %v1701_v45 = vpop.f32.mrf.mxu3 }
0x156c   :  { %v1705_v46 = vadd.f32 %v1701_v45, %v1582_v44 }
0x156e   :  { %2333 = vtanh.f32 %v1705_v46  ;;  %v2215_v11 = vmul.f32 -1.442695, %v1705_v46 }
0x1570   :  { %2335 = vpow2.f32 %v2215_v11 }
0x1573   :  { %v1703_v37 = vpop.f32.mrf.mxu3 }
0x1574   :  { %v2334_v40 = vpop.eup %2333 }
0x1575   :  { %1728 = vrot.lane.b32.xlu1 %v2334_v40, %s2525_s3 }
0x1576   :  { %v2336_v30 = vpop.eup %2335 }
0x1577   :  { %v1709_v42 = vadd.f32 1.0, %v2336_v30 }
0x1579   :  { %2337 = vrcp.f32 %v1709_v42  ;;  %v1721_v43 = vand.u32 2147483648, %v1709_v42  ;;  %vm1715_vm9 = vweird.f32 %v1709_v42  ;;  %v1719_v48 = vand.u32 2147483647, %v1709_v42 }
0x157b   :  { %v1722_v50 = vor.u32 1.1754944e-38, %v1721_v43  ;;  %vm1720_vm11 = vcmp.eq.f32.partialorder %v1719_v48, 8.507059e+37  ;;  %v1589_v43 = vpop.f32.mrf.mxu1 }
0x157f   :  { %v2338_v32 = vpop.eup %2337 }
0x1580   :  { %v1711_v17 = vmul.f32 %v2338_v32, %v1709_v42  ;;  %vm1716_vm8 = vweird.f32 %v2338_v32  ;;  %v1257_v42 = vadd.f32 %v2814_v38, %v2868_v1 }
0x1581   :  { %vm1717_vm10 = vmor %vm1715_vm9, %vm1716_vm8 }
0x1582   :  { %v1712_v31 = vsub.f32 1.0, %v1711_v17 }
0x1584   :  { %v1713_v47 = vmul.f32 %v2338_v32, %v1712_v31  ;;  %v1536_v31 = vpop.f32.mrf.mxu0 }
0x1586   :  { %v1714_v15 = vadd.f32 %v2338_v32, %v1713_v47 }
0x1588   :  { %v1718_v49 = vsel %vm1717_vm10, %v2338_v32, %v1714_v15  ;;  %v1342_v32 = vadd.f32 %v2866_v63, %v1257_v42 }
0x1589   :  { %v1723_v6 = vsel %vm1720_vm11, %v1722_v50, %v1718_v49 }
0x158a   :  { %v1726_v52 = vmul.f32 %v1723_v6, %v1677_v20  ;;  %v1403_v17 = vadd.f32 %v2872_v0, %v1342_v32 }
0x158c   :  { %v1468_v47 = vadd.f32 %v2874_v10, %v1403_v17 }
0x158e   :  { %v1537_v15 = vadd.f32 %v1536_v31, %v1468_v47 }
0x1590   :  { %v1590_v48 = vadd.f32 %v1589_v43, %v1537_v15 }
0x15e7   :  { %v1729_v5 = vpop.permute.xlu1 %1728 }
0x15e8   :  { %v1731_v26 = vmul.f32 %v1729_v5, %v1723_v6 }
0x15ea   :  { %1733 = vrot.lane.b32.xlu2 %v1731_v26, %s2525_s3 }
0x1644   :  { %v1734_v13 = vpop.permute.xlu2 %1733 }
0x1645   :  { %v1736_v12 = vadd.f32 %v1734_v13, %v1726_v52 }
0x1647   :  { %2339 = vtanh.f32 %v1736_v12 }
0x164d   :  { %v2340_v55 = vpop.eup %2339 }
0x164e   :  { %1739 = vrot.lane.b32.xlu0 %v2340_v55, %s2525_s3 }
0x16c0   :  { %v1740_v53 = vpop.permute.xlu0 %1739 }
0x16c1   :  { %v1742_v54 = vmul.f32 %v1740_v53, %v1723_v6 }
0x16c3   :  { %v1744_v18 = vpack.c.bf16 %v1742_v54, %v1742_v54 }
0x16c5   :  { %1746 = vrot.lane.b32.xlu1 %v1744_v18, %s2521_s25 }
0x1737   :  { %v1747_v8 = vpop.permute.xlu1 %1746 }
0x1738   :  { %2216 = vmatmul.msk.bf16.vlgmr.msrb.gmra.mxu2 %vm532_vm5, %v1747_v8 }
0x1739   :  { %1993 = vmatpush.bf16.msrb.mxu2 %v2827_v36 }
0x173d   :  { %1994 = vmatpush.bf16.msrb.mxu2 %v2830_v39 }
0x17bb   :  { %v1760_v60 = vpop.f32.mrf.mxu2 }
0x17bc   :  { %v1764_v61 = vadd.f32 %v1760_v60, %v1586_v59 }
0x17be   :  { %2341 = vtanh.f32 %v1764_v61  ;;  %v2217_v2 = vmul.f32 -1.442695, %v1764_v61 }
0x17c0   :  { %2343 = vpow2.f32 %v2217_v2 }
0x17c3   :  { %v1762_v29 = vpop.f32.mrf.mxu2 }
0x17c4   :  { %v2342_v62 = vpop.eup %2341 }
0x17c5   :  { %1787 = vrot.lane.b32.xlu2 %v2342_v62, %s2525_s3  ;;  %v1540_v62 = vpop.f32.mrf.mxu0 }
0x17c6   :  { %v2344_v7 = vpop.eup %2343  ;;  %v1541_v2 = vadd.f32 %v1540_v62, %v2879_v16 }
0x17c7   :  { %v1768_v51 = vadd.f32 1.0, %v2344_v7  ;;  %v1593_v7 = vpop.f32.mrf.mxu1 }
0x17c9   :  { %2345 = vrcp.f32 %v1768_v51  ;;  %v1780_v9 = vand.u32 2147483648, %v1768_v51  ;;  %vm1774_vm13 = vweird.f32 %v1768_v51  ;;  %v1778_v21 = vand.u32 2147483647, %v1768_v51 }
0x17cb   :  { %v1781_v23 = vor.u32 1.1754944e-38, %v1780_v9  ;;  %vm1779_vm15 = vcmp.eq.f32.partialorder %v1778_v21, 8.507059e+37 }
0x17cd   :  { %v1544_v43 = vpop.f32.mrf.mxu0 }
0x17cf   :  { %v2346_v3 = vpop.eup %2345 }
0x17d0   :  { %v1770_v4 = vmul.f32 %v2346_v3, %v1768_v51  ;;  %vm1775_vm12 = vweird.f32 %v2346_v3  ;;  %v1594_v51 = vadd.f32 %v1593_v7, %v1541_v2 }
0x17d1   :  { %vm1776_vm14 = vmor %vm1774_vm13, %vm1775_vm12 }
0x17d2   :  { %v1771_v20 = vsub.f32 1.0, %v1770_v4 }
0x17d4   :  { %v1772_v19 = vmul.f32 %v2346_v3, %v1771_v20 }
0x17d5   :  { %v1548_v2 = vpop.f32.mrf.mxu0 }
0x17d6   :  { %v1773_v58 = vadd.f32 %v2346_v3, %v1772_v19  ;;  %v1549_v7 = vadd.f32 %v1548_v2, %v2888_v41 }
0x17d8   :  { %v1777_v22 = vsel %vm1776_vm14, %v2346_v3, %v1773_v58 }
0x17d9   :  { %v1782_v27 = vsel %vm1779_vm15, %v1781_v23, %v1777_v22 }
0x17da   :  { %v1785_v35 = vmul.f32 %v1782_v27, %v1736_v12 }
0x181f   :  { %v1788_v25 = vpop.permute.xlu2 %1787 }
0x1820   :  { %v1790_v34 = vmul.f32 %v1788_v25, %v1782_v27 }
0x1822   :  { %1792 = vrot.lane.b32.xlu0 %v1790_v34, %s2525_s3 }
0x1894   :  { %v1793_v44 = vpop.permute.xlu0 %1792 }
0x1895   :  { %v1795_v45 = vadd.f32 %v1793_v44, %v1785_v35 }
0x1897   :  { %2347 = vtanh.f32 %v1795_v45 }
0x189d   :  { %v2348_v46 = vpop.eup %2347 }
0x189e   :  { %1798 = vrot.lane.b32.xlu1 %v2348_v46, %s2525_s3 }
0x1910   :  { %v1799_v37 = vpop.permute.xlu1 %1798 }
0x1911   :  { %v1801_v40 = vmul.f32 %v1799_v37, %v1782_v27 }
0x1913   :  { %v1803_v11 = vpack.c.bf16 %v1801_v40, %v1801_v40 }
0x1915   :  { %1805 = vrot.lane.b32.xlu2 %v1803_v11, %s2521_s25 }
0x196f   :  { %v1806_v30 = vpop.permute.xlu2 %1805 }
0x1970   :  { %2218 = vmatmul.msk.bf16.vlgmr.msrb.gmra.mxu3 %vm532_vm5, %v1806_v30 }
0x1971   :  { %2052 = vmatpush.bf16.msrb.mxu3 %v2827_v36 }
0x1975   :  { %2053 = vmatpush.bf16.msrb.mxu3 %v2830_v39 }
0x19f3   :  { %v1819_v49 = vpop.f32.mrf.mxu3 }
0x19f4   :  { %v1823_v50 = vadd.f32 %v1819_v49, %v1590_v48  ;;  %v1545_v48 = vadd.f32 %v1544_v43, %v2884_v28  ;;  %v1597_v49 = vpop.f32.mrf.mxu1  ;;  %v1552_v43 = vpop.f32.mrf.mxu0 }
0x19f6   :  { %2349 = vtanh.f32 %v1823_v50  ;;  %v2219_v39 = vmul.f32 -1.442695, %v1823_v50  ;;  %v1598_v50 = vadd.f32 %v1597_v49, %v1545_v48  ;;  %v1492_v48 = vadd.f32 %v2905_v24, %v2895_v33 }
0x19f8   :  { %2351 = vpow2.f32 %v2219_v39  ;;  %v1553_v49 = vadd.f32 %v1552_v43, %v1492_v48 }
0x19fb   :  { %v1821_v5 = vpop.f32.mrf.mxu3 }
0x19fc   :  { %v2350_v36 = vpop.eup %2349 }
0x19fd   :  { %1846 = vrot.lane.b32.xlu0 %v2350_v36, %s2525_s3 }
0x19fe   :  { %v2352_v38 = vpop.eup %2351 }
0x19ff   :  { %v1827_v1 = vadd.f32 1.0, %v2352_v38 }
0x1a01   :  { %2353 = vrcp.f32 %v1827_v1  ;;  %v1839_v52 = vand.u32 2147483648, %v1827_v1  ;;  %vm1833_vm1 = vweird.f32 %v1827_v1  ;;  %v1837_v13 = vand.u32 2147483647, %v1827_v1 }
0x1a03   :  { %v1840_v55 = vor.u32 1.1754944e-38, %v1839_v52  ;;  %vm1838_vm3 = vcmp.eq.f32.partialorder %v1837_v13, 8.507059e+37 }
0x1a07   :  { %v2354_v63 = vpop.eup %2353 }
0x1a08   :  { %v1829_v0 = vmul.f32 %v2354_v63, %v1827_v1  ;;  %vm1834_vm0 = vweird.f32 %v2354_v63 }
0x1a09   :  { %vm1835_vm2 = vmor %vm1833_vm1, %vm1834_vm0 }
0x1a0a   :  { %v1830_v6 = vsub.f32 1.0, %v1829_v0 }
0x1a0c   :  { %v1831_v26 = vmul.f32 %v2354_v63, %v1830_v6 }
0x1a0e   :  { %v1832_v10 = vadd.f32 %v2354_v63, %v1831_v26 }
0x1a10   :  { %v1836_v12 = vsel %vm1835_vm2, %v2354_v63, %v1832_v10 }
0x1a11   :  { %v1841_v54 = vsel %vm1838_vm3, %v1840_v55, %v1836_v12 }
0x1a12   :  { %v1844_v8 = vmul.f32 %v1841_v54, %v1795_v45 }
0x1a6f   :  { %v1847_v53 = vpop.permute.xlu0 %1846 }
0x1a70   :  { %v1849_v18 = vmul.f32 %v1847_v53, %v1841_v54 }
0x1a72   :  { %1851 = vrot.lane.b32.xlu1 %v1849_v18, %s2525_s3 }
0x1ae4   :  { %v1852_v56 = vpop.permute.xlu1 %1851 }
0x1ae5   :  { %v1854_v57 = vadd.f32 %v1852_v56, %v1844_v8 }
0x1ae7   :  { %2355 = vtanh.f32 %v1854_v57 }
0x1aed   :  { %v2356_v14 = vpop.eup %2355 }
0x1aee   :  { %1857 = vrot.lane.b32.xlu2 %v2356_v14, %s2525_s3 }
0x1b48   :  { %v1858_v59 = vpop.permute.xlu2 %1857 }
0x1b49   :  { %v1860_v60 = vmul.f32 %v1858_v59, %v1841_v54 }
0x1b4b   :  { %v1862_v61 = vpack.c.bf16 %v1860_v60, %v1860_v60 }
0x1b4d   :  { %1864 = vrot.lane.b32.xlu0 %v1862_v61, %s2521_s25 }
0x1bbf   :  { %v1865_v29 = vpop.permute.xlu0 %1864 }
0x1bc0   :  { %2220 = vmatmul.msk.bf16.vlgmr.msra.gmra.mxu2 %vm532_vm5, %v1865_v29 }
0x1c43   :  { %v1878_v3 = vpop.f32.mrf.mxu2 }
0x1c44   :  { %v1882_v4 = vadd.f32 %v1878_v3, %v1594_v51  ;;  %v1601_v51 = vpop.f32.mrf.mxu1 }
0x1c45   :  { %v1602_v3 = vadd.f32 %v1601_v51, %v1549_v7 }
0x1c46   :  { %2357 = vtanh.f32 %v1882_v4  ;;  %v2221_v58 = vmul.f32 -1.442695, %v1882_v4 }
0x1c48   :  { %2359 = vpow2.f32 %v2221_v58 }
0x1c4b   :  { %v1880_v20 = vpop.f32.mrf.mxu2 }
0x1c4c   :  { %v2358_v19 = vpop.eup %2357 }
0x1c4d   :  { %1905 = vrot.lane.b32.xlu1 %v2358_v19, %s2525_s3 }
0x1c4e   :  { %v2360_v9 = vpop.eup %2359 }
0x1c4f   :  { %v1886_v21 = vadd.f32 1.0, %v2360_v9 }
0x1c51   :  { %2361 = vrcp.f32 %v1886_v21  ;;  %v1898_v16 = vand.u32 2147483648, %v1886_v21  ;;  %vm1892_vm6 = vweird.f32 %v1886_v21  ;;  %v1896_v35 = vand.u32 2147483647, %v1886_v21 }
0x1c53   :  { %v1899_v45 = vor.u32 1.1754944e-38, %v1898_v16  ;;  %vm1897_vm8 = vcmp.eq.f32.partialorder %v1896_v35, 8.507059e+37 }
0x1c57   :  { %v2362_v22 = vpop.eup %2361 }
0x1c58   :  { %v1888_v23 = vmul.f32 %v2362_v22, %v1886_v21  ;;  %vm1893_vm4 = vweird.f32 %v2362_v22 }
0x1c59   :  { %vm1894_vm7 = vmor %vm1892_vm6, %vm1893_vm4  ;;  %vm2117_vm6 = vcmask 7168  }
0x1c5a   :  { %v1889_v25 = vsub.f32 1.0, %v1888_v23 }
0x1c5c   :  { %v1890_v27 = vmul.f32 %v2362_v22, %v1889_v25 }
0x1c5e   :  { %v1891_v34 = vadd.f32 %v2362_v22, %v1890_v27 }
0x1c60   :  { %v1895_v44 = vsel %vm1894_vm7, %v2362_v22, %v1891_v34 }
0x1c61   :  { %v1900_v37 = vsel %vm1897_vm8, %v1899_v45, %v1895_v44 }
0x1c62   :  { %v1903_v11 = vmul.f32 %v1900_v37, %v1854_v57 }
0x1cbf   :  { %v1906_v46 = vpop.permute.xlu1 %1905 }
0x1cc0   :  { %v1908_v40 = vmul.f32 %v1906_v46, %v1900_v37 }
0x1cc2   :  { %1910 = vrot.lane.b32.xlu2 %v1908_v40, %s2525_s3 }
0x1d1c   :  { %v1911_v30 = vpop.permute.xlu2 %1910 }
0x1d1d   :  { %v1913_v42 = vadd.f32 %v1911_v30, %v1903_v11 }
0x1d1f   :  { %2363 = vtanh.f32 %v1913_v42 }
0x1d25   :  { %v2364_v32 = vpop.eup %2363 }
0x1d26   :  { %1916 = vrot.lane.b32.xlu0 %v2364_v32, %s2525_s3 }
0x1d98   :  { %v1917_v17 = vpop.permute.xlu0 %1916 }
0x1d99   :  { %v1919_v31 = vmul.f32 %v1917_v17, %v1900_v37 }
0x1d9b   :  { %v1921_v47 = vpack.c.bf16 %v1919_v31, %v1919_v31 }
0x1d9d   :  { %1923 = vrot.lane.b32.xlu1 %v1921_v47, %s2521_s25 }
0x1e0f   :  { %v1924_v15 = vpop.permute.xlu1 %1923 }
0x1e10   :  { %2222 = vmatmul.msk.bf16.vlgmr.msra.gmra.mxu3 %vm532_vm5, %v1924_v15 }
0x1e93   :  { %v1937_v5 = vpop.f32.mrf.mxu3 }
0x1e94   :  { %v1941_v36 = vadd.f32 %v1937_v5, %v1598_v50  ;;  %v1605_v50 = vpop.f32.mrf.mxu1 }
0x1e95   :  { %v1606_v5 = vadd.f32 %v1605_v50, %v1553_v49 }
0x1e96   :  { %2365 = vtanh.f32 %v1941_v36  ;;  %v2223_v1 = vmul.f32 -1.442695, %v1941_v36 }
0x1e98   :  { %2367 = vpow2.f32 %v2223_v1 }
0x1e9b   :  { %v1939_v39 = vpop.f32.mrf.mxu3 }
0x1e9c   :  { %v2366_v38 = vpop.eup %2365 }
0x1e9d   :  { %1964 = vrot.lane.b32.xlu2 %v2366_v38, %s2525_s3 }
0x1e9e   :  { %v2368_v63 = vpop.eup %2367 }
0x1e9f   :  { %v1945_v0 = vadd.f32 1.0, %v2368_v63 }
0x1ea1   :  { %2369 = vrcp.f32 %v1945_v0  ;;  %v1957_v28 = vand.u32 2147483648, %v1945_v0  ;;  %vm1951_vm10 = vweird.f32 %v1945_v0  ;;  %v1955_v12 = vand.u32 2147483647, %v1945_v0 }
0x1ea3   :  { %v1958_v53 = vor.u32 1.1754944e-38, %v1957_v28  ;;  %vm1956_vm12 = vcmp.eq.f32.partialorder %v1955_v12, 8.507059e+37 }
0x1ea7   :  { %v2370_v6 = vpop.eup %2369 }
0x1ea8   :  { %v1947_v26 = vmul.f32 %v2370_v6, %v1945_v0  ;;  %vm1952_vm9 = vweird.f32 %v2370_v6 }
0x1ea9   :  { %vm1953_vm11 = vmor %vm1951_vm10, %vm1952_vm9 }
0x1eaa   :  { %v1948_v10 = vsub.f32 1.0, %v1947_v26 }
0x1eac   :  { %v1949_v52 = vmul.f32 %v2370_v6, %v1948_v10 }
0x1eae   :  { %v1950_v13 = vadd.f32 %v2370_v6, %v1949_v52 }
0x1eb0   :  { %v1954_v55 = vsel %vm1953_vm11, %v2370_v6, %v1950_v13 }
0x1eb1   :  { %v1959_v18 = vsel %vm1956_vm12, %v1958_v53, %v1954_v55 }
0x1eb2   :  { %v1962_v56 = vmul.f32 %v1959_v18, %v1913_v42 }
0x1ef7   :  { %v1965_v54 = vpop.permute.xlu2 %1964 }
0x1ef8   :  { %v1967_v8 = vmul.f32 %v1965_v54, %v1959_v18 }
0x1efa   :  { %1969 = vrot.lane.b32.xlu0 %v1967_v8, %s2525_s3  ;;  %v2260_v8 = vld [vmem:[%s2973_s7] ss:$0 sm:$0xff]  ;;  %s2526_s7 = smov 96  }
0x1f6c   :  { %v1970_v57 = vpop.permute.xlu0 %1969 }
0x1f6d   :  { %v1972_v14 = vadd.f32 %v1970_v57, %v1962_v56 }
0x1f6f   :  { %2371 = vtanh.f32 %v1972_v14 }
0x1f75   :  { %v2372_v59 = vpop.eup %2371 }
0x1f76   :  { %1975 = vrot.lane.b32.xlu1 %v2372_v59, %s2525_s3 }
0x1fe8   :  { %v1976_v60 = vpop.permute.xlu1 %1975 }
0x1fe9   :  { %v1978_v61 = vmul.f32 %v1976_v60, %v1959_v18 }
0x1feb   :  { %v1980_v29 = vpack.c.bf16 %v1978_v61, %v1978_v61 }
0x1fed   :  { %1982 = vrot.lane.b32.xlu2 %v1980_v29, %s2521_s25 }
0x2047   :  { %v1983_v62 = vpop.permute.xlu2 %1982 }
0x2048   :  { %2224 = vmatmul.msk.bf16.vlgmr.msrb.gmra.mxu2 %vm532_vm5, %v1983_v62 }
0x20cb   :  { %v1996_v4 = vpop.f32.mrf.mxu2 }
0x20cc   :  { %v2000_v20 = vadd.f32 %v1996_v4, %v1602_v3 }
0x20ce   :  { %2373 = vtanh.f32 %v2000_v20  ;;  %v2225_v9 = vmul.f32 -1.442695, %v2000_v20 }
0x20d0   :  { %2375 = vpow2.f32 %v2225_v9 }
0x20d3   :  { %v1998_v19 = vpop.f32.mrf.mxu2 }
0x20d4   :  { %v2374_v58 = vpop.eup %2373 }
0x20d5   :  { %2023 = vrot.lane.b32.xlu0 %v2374_v58, %s2525_s3 }
0x20d6   :  { %v2376_v21 = vpop.eup %2375 }
0x20d7   :  { %v2004_v22 = vadd.f32 1.0, %v2376_v21 }
0x20d9   :  { %2377 = vrcp.f32 %v2004_v22  ;;  %v2016_v41 = vand.u32 2147483648, %v2004_v22  ;;  %vm2010_vm14 = vweird.f32 %v2004_v22  ;;  %v2014_v35 = vand.u32 2147483647, %v2004_v22 }
0x20db   :  { %v2017_v45 = vor.u32 1.1754944e-38, %v2016_v41  ;;  %vm2015_vm0 = vcmp.eq.f32.partialorder %v2014_v35, 8.507059e+37 }
0x20df   :  { %v2378_v23 = vpop.eup %2377 }
0x20e0   :  { %v2006_v25 = vmul.f32 %v2378_v23, %v2004_v22  ;;  %vm2011_vm13 = vweird.f32 %v2378_v23 }
0x20e1   :  { %vm2012_vm15 = vmor %vm2010_vm14, %vm2011_vm13 }
0x20e2   :  { %v2007_v27 = vsub.f32 1.0, %v2006_v25 }
0x20e4   :  { %v2008_v34 = vmul.f32 %v2378_v23, %v2007_v27 }
0x20e6   :  { %v2009_v16 = vadd.f32 %v2378_v23, %v2008_v34 }
0x20e8   :  { %v2013_v44 = vsel %vm2012_vm15, %v2378_v23, %v2009_v16 }
0x20e9   :  { %v2018_v37 = vsel %vm2015_vm0, %v2017_v45, %v2013_v44 }
0x20ea   :  { %v2021_v11 = vmul.f32 %v2018_v37, %v1972_v14 }
0x2147   :  { %v2024_v46 = vpop.permute.xlu0 %2023 }
0x2148   :  { %v2026_v40 = vmul.f32 %v2024_v46, %v2018_v37 }
0x214a   :  { %2028 = vrot.lane.b32.xlu1 %v2026_v40, %s2525_s3 }
0x21bc   :  { %v2029_v30 = vpop.permute.xlu1 %2028 }
0x21bd   :  { %v2031_v42 = vadd.f32 %v2029_v30, %v2021_v11 }
0x21bf   :  { %2379 = vtanh.f32 %v2031_v42 }
0x21c5   :  { %v2380_v32 = vpop.eup %2379 }
0x21c6   :  { %2034 = vrot.lane.b32.xlu2 %v2380_v32, %s2525_s3 }
0x2220   :  { %v2035_v17 = vpop.permute.xlu2 %2034 }
0x2221   :  { %v2037_v31 = vmul.f32 %v2035_v17, %v2018_v37 }
0x2223   :  { %v2039_v47 = vpack.c.bf16 %v2037_v31, %v2037_v31 }
0x2225   :  { %2041 = vrot.lane.b32.xlu0 %v2039_v47, %s2521_s25 }
0x2297   :  { %v2042_v15 = vpop.permute.xlu0 %2041 }
0x2298   :  { %2226 = vmatmul.msk.bf16.vlgmr.msrb.gmra.mxu3 %vm532_vm5, %v2042_v15 }
0x231b   :  { %v2055_v36 = vpop.f32.mrf.mxu3 }
0x231c   :  { %v2059_v39 = vadd.f32 %v2055_v36, %v1606_v5 }
0x231e   :  { %2381 = vtanh.f32 %v2059_v39  ;;  %v2227_v63 = vmul.f32 -1.442695, %v2059_v39 }
0x2320   :  { %2383 = vpow2.f32 %v2227_v63 }
0x2323   :  { %v2057_v38 = vpop.f32.mrf.mxu3 }
0x2324   :  { %v2382_v1 = vpop.eup %2381 }
0x2325   :  { %2082 = vrot.lane.b32.xlu1 %v2382_v1, %s2525_s3 }
0x2326   :  { %v2384_v0 = vpop.eup %2383 }
0x2327   :  { %v2063_v6 = vadd.f32 1.0, %v2384_v0 }
0x2329   :  { %2385 = vrcp.f32 %v2063_v6  ;;  %v2075_v24 = vand.u32 2147483648, %v2063_v6  ;;  %vm2069_vm2 = vweird.f32 %v2063_v6  ;;  %v2073_v28 = vand.u32 2147483647, %v2063_v6 }
0x232b   :  { %v2076_v55 = vor.u32 1.1754944e-38, %v2075_v24  ;;  %vm2074_vm4 = vcmp.eq.f32.partialorder %v2073_v28, 8.507059e+37 }
0x232d   :  { %2100 = vrot.lane.b32.xlu1 %v2260_v8, %s2521_s25 }
0x232f   :  { %v2386_v26 = vpop.eup %2385 }
0x2330   :  { %v2065_v10 = vmul.f32 %v2386_v26, %v2063_v6  ;;  %vm2070_vm1 = vweird.f32 %v2386_v26 }
0x2331   :  { %vm2071_vm3 = vmor %vm2069_vm2, %vm2070_vm1 }
0x2332   :  { %v2066_v52 = vsub.f32 1.0, %v2065_v10 }
0x2334   :  { %v2067_v13 = vmul.f32 %v2386_v26, %v2066_v52 }
0x2336   :  { %v2068_v33 = vadd.f32 %v2386_v26, %v2067_v13 }
0x2338   :  { %v2072_v12 = vsel %vm2071_vm3, %v2386_v26, %v2068_v33 }
0x2339   :  { %v2077_v54 = vsel %vm2074_vm4, %v2076_v55, %v2072_v12 }
0x233a   :  { %v2080_v56 = vmul.f32 %v2077_v54, %v2031_v42 }
0x2397   :  { %v2083_v53 = vpop.permute.xlu1 %2082 }
0x2398   :  { %v2085_v18 = vmul.f32 %v2083_v53, %v2077_v54 }
0x239a   :  { %2087 = vrot.lane.b32.xlu2 %v2085_v18, %s2525_s3 }
0x239f   :  { %v2101_v61 = vpop.permute.xlu1 %2100 }
0x23f4   :  { %v2088_v57 = vpop.permute.xlu2 %2087 }
0x23f5   :  { %v2090_v14 = vadd.f32 %v2088_v57, %v2080_v56 }
0x23f7   :  { %2387 = vtanh.f32 %v2090_v14 }
0x23fd   :  { %v2388_v59 = vpop.eup %2387 }
0x23fe   :  { %2093 = vrot.lane.b32.xlu0 %v2388_v59, %s2525_s3 }
0x2470   :  { %v2094_v60 = vpop.permute.xlu0 %2093 }
0x2471   :  { %v2096_v29 = vmul.f32 %v2094_v60, %v2077_v54 }
0x2473   :  { %v2103_v62 = vmul.f32 %v2101_v61, %v2096_v29 }
0x2475   :  { %2105 = vrot.lane.b32.xlu2 %v2103_v62, %s2521_s25 }
0x24cf   :  { %v2106_v2 = vpop.permute.xlu2 %2105 }
0x24d0   :  { %v2108_v7 = vsel %vm532_vm5, %v2106_v2, 0.0 }
0x24d1   :  { %2109 = vadd.xlane.f32.xlu0 %v2108_v7 }
0x2544   :  { %v2110_v51 = vpop.xlane.xlu0 %2109 }
0x2545   :  { %v2112_v3 = vadd.f32 %v2260_v8, %v2110_v51 }
0x2547   :  { %2114 = vrot.lane.b32.xlu1 %v2112_v3, %s2526_s7 }
0x25b9   :  { %v2115_v4 = vpop.permute.xlu1 %2114 }
0x25ba   :  { %2118 = vst.msk [vmem:[%s2974_s8] sm:$0xff] %vm2117_vm6, %v2115_v4 }
0x25bb   :  { %2123 = vsyncpa [#allocation5], 1 }
0x25bc   :  { %2124 = vsyncpa [#allocation7], 1 }
0x25bd   :  { %2125 = vsyncpa [#allocation10], 1 }

</bundles_post_ra>
